<compile_context>
chip_gen: v7x
topology: tpu7x:2x2x1
jax: 0.10.0
libtpu: 0.0.40
codegen_flags: <defaults>
</compile_context>

<pallas_src>
import functools

import numpy as np
import jax
import jax.numpy as jnp
from jax.experimental import pallas as pl
from jax.experimental.pallas import tpu as pltpu


def _halo_masks(H, W):
    """(9, H*W) f32 validity masks for the 9 taps of a padding=1 3x3 conv."""
    ii, jj = np.meshgrid(np.arange(H), np.arange(W), indexing="ij")
    masks = []
    for kh in range(3):
        for kw in range(3):
            dh, dw = kh - 1, kw - 1
            valid = ((ii + dh >= 0) & (ii + dh < H) &
                     (jj + dw >= 0) & (jj + dw < W))
            masks.append(valid.reshape(-1))
    return jnp.asarray(np.stack(masks).astype(np.float32))


def _im2col_t(feat, masks, W, HW, out_dtype):
    """(C, HW) feature map -> (9*C, HW) transposed im2col patch matrix.

    Each 3x3 tap (kh, kw) is a static lane-roll of the flattened map by
    (kh-1)*W + (kw-1) followed by a (1, HW) edge mask (zero padding).
    No padded scratch, no halo zero-fill stores; rolls run on the XLU slot.
    """
    slabs = []
    k = 0
    for kh in range(3):
        for kw in range(3):
            s = (kh - 1) * W + (kw - 1)
            rolled = feat if s == 0 else pltpu.roll(feat, (-s) % HW, 1)
            slabs.append(rolled * masks[k:k + 1, :])
            k += 1
    return jnp.concatenate(slabs, axis=0).astype(out_dtype)


def dense_motion_kernel(x_flat_ref, x_rows_ref, masks_ref, w1_ref, w2_ref, b2_ref,
                        res_ref, grid_ref, *, H, W, Cin, Cmid, eps=1e-5):
    HW = H * W
    masks = masks_ref[...]                       # (9, HW)  f32
    x_flat = x_flat_ref[0]                       # (Cin, HW) f32, HW in lanes

    # ---- conv1: (Cmid, 9*Cin) @ (9*Cin, HW) on the MXU (bf16 in, f32 acc) ----
    # conv1 bias intentionally skipped: a per-channel constant is exactly
    # cancelled by the affine-free InstanceNorm mean subtraction below.
    p1 = _im2col_t(x_flat, masks, W, HW, jnp.bfloat16)        # (9*Cin, HW)
    h = jnp.dot(w1_ref[...], p1, preferred_element_type=jnp.float32)  # (Cmid, HW)

    # ---- InstanceNorm2d(affine=False) + ReLU: lane-axis (spatial) reductions ----
    mean = jnp.mean(h, axis=1, keepdims=True)                 # (Cmid, 1)
    var = jnp.mean(jnp.square(h - mean), axis=1, keepdims=True)
    h = jnp.maximum((h - mean) * jax.lax.rsqrt(var + eps), 0.0)

    # ---- conv2 -> sampling grid (kept in f32 for coordinate fidelity) ----
    p2 = _im2col_t(h, masks, W, HW, jnp.float32)              # (9*Cmid, HW)
    g = jnp.dot(w2_ref[...], p2, preferred_element_type=jnp.float32)  # (2, HW)
    g = g + b2_ref[...]                                       # (2,1) broadcast

    grid_ref[0] = g                                           # un-flipped; wrapper flips

    # ---- F.grid_sample(x, grid, align_corners=True, zeros padding) ------------
    # Separable bilinear: res[c,p] = sum_h A[h,p] * (sum_w x[c,h,w] * B[w,p]).
    gx = g[0:1, :]                                            # x -> width coord
    gy = g[1:2, :]                                            # y -> height coord
    ix = (gx + 1.0) * (0.5 * (W - 1))
    iy = (gy + 1.0) * (0.5 * (H - 1))
    ix0 = jnp.floor(ix)
    iy0 = jnp.floor(iy)
    wx1 = ix - ix0
    wx0 = 1.0 - wx1
    wy1 = iy - iy0
    wy0 = 1.0 - wy1
    ix0i = ix0.astype(jnp.int32)
    iy0i = iy0.astype(jnp.int32)
    ix1i = ix0i + 1
    iy1i = iy0i + 1

    def onehot_weights(n, i0, i1, w0, w1v):
        # (n, HW): per output pixel p, bilinear weight of index row/col i along
        # this axis.  OOB indices match no row -> contribute 0 (zeros padding).
        rows = jax.lax.broadcasted_iota(jnp.int32, (n, HW), 0)
        return jnp.where(rows == i0, w0, 0.0) + jnp.where(rows == i1, w1v, 0.0)

    Bmat = onehot_weights(W, ix0i, ix1i, wx0, wx1)            # (W, HW)
    Amat = onehot_weights(H, iy0i, iy1i, wy0, wy1)            # (H, HW)

    # Contract over W on the MXU: S[(c,h), p] = sum_w x[c,h,w] * B[w,p].
    S = jnp.dot(x_rows_ref[0], Bmat, preferred_element_type=jnp.float32)  # (Cin*H, HW)

    # Contract over H on the VPU (tiny per-channel masked reduce).
    out_rows = []
    for c in range(Cin):
        out_rows.append(jnp.sum(Amat * S[c * H:(c + 1) * H, :],
                                axis=0, keepdims=True))        # (1, HW)
    res_ref[0] = jnp.concatenate(out_rows, axis=0)             # (Cin, HW), lane-dense


def dense_motion_forward(x_nchw, params):
    """Mirror of DenseMotion.forward. x is NCHW (PyTorch convention).

    Returns (module_output == x, res = grid_sample(x, grid) [NCHW], grid [NHWC]).
    """
    B, Cin, H, W = x_nchw.shape
    HW = H * W
    Cmid = params["w1"].shape[0]

    x_f32 = x_nchw.astype(jnp.float32)
    x_flat = x_f32.reshape(B, Cin, HW)        # HW in lanes (conv path)
    x_rows = x_f32.reshape(B, Cin * H, W)     # W contraction operand (sampling path)

    # PyTorch OIHW -> (Cout, kh, kw, Cin) -> (Cout, 9*Cin), matching the patch-row
    # order (kh, kw, cin) produced by _im2col_t.  w1 cast to bf16 once here.
    w1_r = jnp.transpose(params["w1"], (0, 2, 3, 1)).reshape(Cmid, 9 * Cin).astype(jnp.bfloat16)
    w2_r = jnp.transpose(params["w2"], (0, 2, 3, 1)).reshape(2, 9 * Cmid).astype(jnp.float32)
    b2 = params["b2"].reshape(2, 1).astype(jnp.float32)
    # params["b1"] is NOT passed: cancelled exactly by affine-free InstanceNorm.

    masks = _halo_masks(H, W)                 # (9, HW) compile-time constant

    # TODO(synk): on single-TC v5e/v6e, fold several batch elements into one grid
    # step (Bt*HW matmul M dim, per-sample InstanceNorm stats) to amortize the
    # ~0.35us/step overhead; keep >=2 grid steps on v7x (2 TCs).
    kern = functools.partial(dense_motion_kernel, H=H, W=W, Cin=Cin, Cmid=Cmid)
    res_flat, grid_flat = pl.pallas_call(
        kern,
        out_shape=(jax.ShapeDtypeStruct((B, Cin, HW), jnp.float32),
                   jax.ShapeDtypeStruct((B, 2, HW), jnp.float32)),
        grid=(B,),
        in_specs=[
            pl.BlockSpec((1, Cin, HW), lambda b: (b, 0, 0)),
            pl.BlockSpec((1, Cin * H, W), lambda b: (b, 0, 0)),
            pl.BlockSpec((9, HW), lambda b: (0, 0)),
            pl.BlockSpec((Cmid, 9 * Cin), lambda b: (0, 0)),
            pl.BlockSpec((2, 9 * Cmid), lambda b: (0, 0)),
            pl.BlockSpec((2, 1), lambda b: (0, 0)),
        ],
        out_specs=(
            pl.BlockSpec((1, Cin, HW), lambda b: (b, 0, 0)),
            pl.BlockSpec((1, 2, HW), lambda b: (b, 0, 0)),
        ),
        compiler_params=pltpu.CompilerParams(
            dimension_semantics=("parallel",),       # batch across TCs on v7x
            vmem_limit_bytes=32 * 1024 * 1024),
    )(x_flat, x_rows, masks, w1_r, w2_r, b2)

    # grid = grid_map(x).permute(0,2,3,1).flip([1]); res = grid_sample(x, grid).
    # The height flip is pure row re-ordering, so it is applied here (outside the
    # kernel) to both the returned grid and the sampled result.
    grid = jnp.flip(jnp.transpose(grid_flat.reshape(B, 2, H, W), (0, 2, 3, 1)), axis=1)
    res = jnp.flip(res_flat.reshape(B, Cin, H, W), axis=2)
    # forward() returns x unchanged (exactly like the PyTorch module).
    return x_nchw, res, grid


if __name__ == "__main__":
    B, Cin, H, W = 2, 4, 16, 16
    Cmid = 32

    key = jax.random.PRNGKey(0)
    k1, k2, k3, k4, kx = jax.random.split(key, 5)
    params = {
        # PyTorch Conv2d layout: (Cout, Cin, kh, kw)
        "w1": 0.1 * jax.random.normal(k1, (Cmid, Cin, 3, 3), jnp.float32),
        "b1": 0.1 * jax.random.normal(k2, (Cmid,), jnp.float32),  # no-op under IN
        "w2": 0.1 * jax.random.normal(k3, (2, Cmid, 3, 3), jnp.float32),
        "b2": 0.1 * jax.random.normal(k4, (2,), jnp.float32),
    }
    x = jax.random.normal(kx, (B, Cin, H, W), jnp.float32)

    out, res, grid = jax.jit(dense_motion_forward)(x, params)
    jax.block_until_ready((out, res, grid))

    assert out.shape == (B, Cin, H, W)
    assert res.shape == (B, Cin, H, W)
    assert grid.shape == (B, H, W, 2)
    assert bool(jnp.all(jnp.isfinite(res)))
    assert bool(jnp.all(jnp.isfinite(grid)))
    assert bool(jnp.allclose(out, x))  # forward returns input unchanged, per PyTorch code
    print("KERNEL_OK")
</pallas_src>

<mosaic_0001>
module attributes {stable_mosaic.version = 11 : i64} {
  func.func @dense_motion_kernel(%arg0: i32, %arg1: memref<1x4x256xf32, #tpu.memory_space<vmem>>, %arg2: memref<1x64x16xf32, #tpu.memory_space<vmem>>, %arg3: memref<9x256xf32, #tpu.memory_space<vmem>>, %arg4: memref<32x36xbf16, #tpu.memory_space<vmem>>, %arg5: memref<2x288xf32, #tpu.memory_space<vmem>>, %arg6: memref<2x1xf32, #tpu.memory_space<vmem>>, %arg7: memref<1x4x256xf32, #tpu.memory_space<vmem>>, %arg8: memref<1x2x256xf32, #tpu.memory_space<vmem>>) attributes {dimension_semantics = [#tpu.dimension_semantics<parallel>], iteration_bounds = array<i64: 2>, scalar_prefetch = 0 : i64, scratch_operands = 0 : i64, tpu.core_type = #tpu.core_type<tc>, window_params = [{transform_indices = @transform_0, window_bounds = array<i64: 1, 4, 256>}, {transform_indices = @transform_1, window_bounds = array<i64: 1, 64, 16>}, {pipeline_mode = #tpu.pipeline_mode<synchronous>, transform_indices = @transform_2, window_bounds = array<i64: 9, 256>}, {pipeline_mode = #tpu.pipeline_mode<synchronous>, transform_indices = @transform_3, window_bounds = array<i64: 32, 36>}, {pipeline_mode = #tpu.pipeline_mode<synchronous>, transform_indices = @transform_4, window_bounds = array<i64: 2, 288>}, {pipeline_mode = #tpu.pipeline_mode<synchronous>, transform_indices = @transform_5, window_bounds = array<i64: 2, 1>}, {transform_indices = @transform_6, window_bounds = array<i64: 1, 4, 256>}, {transform_indices = @transform_7, window_bounds = array<i64: 1, 2, 256>}]} {
    %c0 = arith.constant 0 : index
    %c0_0 = arith.constant 0 : index
    %0 = vector.load %arg3[%c0, %c0_0] : memref<9x256xf32, #tpu.memory_space<vmem>>, vector<9x256xf32>
    %c0_1 = arith.constant 0 : index
    %c0_2 = arith.constant 0 : index
    %c0_3 = arith.constant 0 : index
    %1 = vector.load %arg1[%c0_1, %c0_2, %c0_3] : memref<1x4x256xf32, #tpu.memory_space<vmem>>, vector<1x4x256xf32>
    %2 = vector.shape_cast %1 : vector<1x4x256xf32> to vector<4x256xf32>
    %c17_i32 = arith.constant 17 : i32
    %3 = tpu.dynamic_rotate %2 by %c17_i32 dim 1 : vector<4x256xf32>, i32 -> vector<4x256xf32>
    %4 = vector.extract_strided_slice %0 {offsets = [0, 0], sizes = [1, 256], strides = [1, 1]} : vector<9x256xf32> to vector<1x256xf32>
    %5 = vector.broadcast %4 : vector<1x256xf32> to vector<4x256xf32>
    %6 = arith.mulf %3, %5 : vector<4x256xf32>
    %c16_i32 = arith.constant 16 : i32
    %7 = tpu.dynamic_rotate %2 by %c16_i32 dim 1 : vector<4x256xf32>, i32 -> vector<4x256xf32>
    %8 = vector.extract_strided_slice %0 {offsets = [1, 0], sizes = [1, 256], strides = [1, 1]} : vector<9x256xf32> to vector<1x256xf32>
    %9 = vector.broadcast %8 : vector<1x256xf32> to vector<4x256xf32>
    %10 = arith.mulf %7, %9 : vector<4x256xf32>
    %c15_i32 = arith.constant 15 : i32
    %11 = tpu.dynamic_rotate %2 by %c15_i32 dim 1 : vector<4x256xf32>, i32 -> vector<4x256xf32>
    %12 = vector.extract_strided_slice %0 {offsets = [2, 0], sizes = [1, 256], strides = [1, 1]} : vector<9x256xf32> to vector<1x256xf32>
    %13 = vector.broadcast %12 : vector<1x256xf32> to vector<4x256xf32>
    %14 = arith.mulf %11, %13 : vector<4x256xf32>
    %c1_i32 = arith.constant 1 : i32
    %15 = tpu.dynamic_rotate %2 by %c1_i32 dim 1 : vector<4x256xf32>, i32 -> vector<4x256xf32>
    %16 = vector.extract_strided_slice %0 {offsets = [3, 0], sizes = [1, 256], strides = [1, 1]} : vector<9x256xf32> to vector<1x256xf32>
    %17 = vector.broadcast %16 : vector<1x256xf32> to vector<4x256xf32>
    %18 = arith.mulf %15, %17 : vector<4x256xf32>
    %19 = vector.extract_strided_slice %0 {offsets = [4, 0], sizes = [1, 256], strides = [1, 1]} : vector<9x256xf32> to vector<1x256xf32>
    %20 = vector.broadcast %19 : vector<1x256xf32> to vector<4x256xf32>
    %21 = arith.mulf %2, %20 : vector<4x256xf32>
    %c255_i32 = arith.constant 255 : i32
    %22 = tpu.dynamic_rotate %2 by %c255_i32 dim 1 : vector<4x256xf32>, i32 -> vector<4x256xf32>
    %23 = vector.extract_strided_slice %0 {offsets = [5, 0], sizes = [1, 256], strides = [1, 1]} : vector<9x256xf32> to vector<1x256xf32>
    %24 = vector.broadcast %23 : vector<1x256xf32> to vector<4x256xf32>
    %25 = arith.mulf %22, %24 : vector<4x256xf32>
    %c241_i32 = arith.constant 241 : i32
    %26 = tpu.dynamic_rotate %2 by %c241_i32 dim 1 : vector<4x256xf32>, i32 -> vector<4x256xf32>
    %27 = vector.extract_strided_slice %0 {offsets = [6, 0], sizes = [1, 256], strides = [1, 1]} : vector<9x256xf32> to vector<1x256xf32>
    %28 = vector.broadcast %27 : vector<1x256xf32> to vector<4x256xf32>
    %29 = arith.mulf %26, %28 : vector<4x256xf32>
    %c240_i32 = arith.constant 240 : i32
    %30 = tpu.dynamic_rotate %2 by %c240_i32 dim 1 : vector<4x256xf32>, i32 -> vector<4x256xf32>
    %31 = vector.extract_strided_slice %0 {offsets = [7, 0], sizes = [1, 256], strides = [1, 1]} : vector<9x256xf32> to vector<1x256xf32>
    %32 = vector.broadcast %31 : vector<1x256xf32> to vector<4x256xf32>
    %33 = arith.mulf %30, %32 : vector<4x256xf32>
    %c239_i32 = arith.constant 239 : i32
    %34 = tpu.dynamic_rotate %2 by %c239_i32 dim 1 : vector<4x256xf32>, i32 -> vector<4x256xf32>
    %35 = vector.extract_strided_slice %0 {offsets = [8, 0], sizes = [1, 256], strides = [1, 1]} : vector<9x256xf32> to vector<1x256xf32>
    %36 = vector.broadcast %35 : vector<1x256xf32> to vector<4x256xf32>
    %37 = arith.mulf %34, %36 : vector<4x256xf32>
    %38 = tpu.concatenate %6, %10, %14, %18, %21, %25, %29, %33, %37 in 0 : vector<4x256xf32>, vector<4x256xf32>, vector<4x256xf32>, vector<4x256xf32>, vector<4x256xf32>, vector<4x256xf32>, vector<4x256xf32>, vector<4x256xf32>, vector<4x256xf32> -> vector<36x256xf32>
    %39 = arith.truncf %38 : vector<36x256xf32> to vector<36x256xbf16>
    %c0_4 = arith.constant 0 : index
    %c0_5 = arith.constant 0 : index
    %40 = vector.load %arg4[%c0_4, %c0_5] : memref<32x36xbf16, #tpu.memory_space<vmem>>, vector<32x36xbf16>
    %cst = arith.constant dense<0.000000e+00> : vector<32x256xf32>
    %41 = tpu.matmul %40, %39, %cst {dimension_numbers = #tpu.dot_dimension_numbers<[1], [0], [0], [1], [0, 0, 1, 1], [], []>} : vector<32x36xbf16>, vector<36x256xbf16>, vector<32x256xf32> -> vector<32x256xf32>
    %cst_6 = arith.constant dense<0.000000e+00> : vector<32xf32>
    %42 = vector.multi_reduction <add>, %41, %cst_6 [1] : vector<32x256xf32> to vector<32xf32>
    %43 = vector.shape_cast %42 : vector<32xf32> to vector<32x1xf32>
    %cst_7 = arith.constant 2.560000e+02 : f32
    %44 = vector.broadcast %cst_7 : f32 to vector<32x1xf32>
    %45 = arith.divf %43, %44 : vector<32x1xf32>
    %46 = vector.broadcast %45 : vector<32x1xf32> to vector<32x256xf32>
    %47 = arith.subf %41, %46 : vector<32x256xf32>
    %48 = arith.mulf %47, %47 : vector<32x256xf32>
    %cst_8 = arith.constant dense<0.000000e+00> : vector<32xf32>
    %49 = vector.multi_reduction <add>, %48, %cst_8 [1] : vector<32x256xf32> to vector<32xf32>
    %50 = vector.shape_cast %49 : vector<32xf32> to vector<32x1xf32>
    %cst_9 = arith.constant 2.560000e+02 : f32
    %51 = vector.broadcast %cst_9 : f32 to vector<32x1xf32>
    %52 = arith.divf %50, %51 : vector<32x1xf32>
    %53 = vector.broadcast %45 : vector<32x1xf32> to vector<32x256xf32>
    %54 = arith.subf %41, %53 : vector<32x256xf32>
    %cst_10 = arith.constant 9.99999974E-6 : f32
    %55 = vector.broadcast %cst_10 : f32 to vector<32x1xf32>
    %56 = arith.addf %52, %55 : vector<32x1xf32>
    %57 = math.rsqrt %56 : vector<32x1xf32>
    %58 = vector.broadcast %57 : vector<32x1xf32> to vector<32x256xf32>
    %59 = arith.mulf %54, %58 : vector<32x256xf32>
    %cst_11 = arith.constant 0.000000e+00 : f32
    %60 = vector.broadcast %cst_11 : f32 to vector<32x256xf32>
    %61 = arith.maximumf %59, %60 : vector<32x256xf32>
    %c17_i32_12 = arith.constant 17 : i32
    %62 = tpu.dynamic_rotate %61 by %c17_i32_12 dim 1 : vector<32x256xf32>, i32 -> vector<32x256xf32>
    %63 = vector.extract_strided_slice %0 {offsets = [0, 0], sizes = [1, 256], strides = [1, 1]} : vector<9x256xf32> to vector<1x256xf32>
    %64 = vector.broadcast %63 : vector<1x256xf32> to vector<32x256xf32>
    %65 = arith.mulf %62, %64 : vector<32x256xf32>
    %c16_i32_13 = arith.constant 16 : i32
    %66 = tpu.dynamic_rotate %61 by %c16_i32_13 dim 1 : vector<32x256xf32>, i32 -> vector<32x256xf32>
    %67 = vector.extract_strided_slice %0 {offsets = [1, 0], sizes = [1, 256], strides = [1, 1]} : vector<9x256xf32> to vector<1x256xf32>
    %68 = vector.broadcast %67 : vector<1x256xf32> to vector<32x256xf32>
    %69 = arith.mulf %66, %68 : vector<32x256xf32>
    %c15_i32_14 = arith.constant 15 : i32
    %70 = tpu.dynamic_rotate %61 by %c15_i32_14 dim 1 : vector<32x256xf32>, i32 -> vector<32x256xf32>
    %71 = vector.extract_strided_slice %0 {offsets = [2, 0], sizes = [1, 256], strides = [1, 1]} : vector<9x256xf32> to vector<1x256xf32>
    %72 = vector.broadcast %71 : vector<1x256xf32> to vector<32x256xf32>
    %73 = arith.mulf %70, %72 : vector<32x256xf32>
    %c1_i32_15 = arith.constant 1 : i32
    %74 = tpu.dynamic_rotate %61 by %c1_i32_15 dim 1 : vector<32x256xf32>, i32 -> vector<32x256xf32>
    %75 = vector.extract_strided_slice %0 {offsets = [3, 0], sizes = [1, 256], strides = [1, 1]} : vector<9x256xf32> to vector<1x256xf32>
    %76 = vector.broadcast %75 : vector<1x256xf32> to vector<32x256xf32>
    %77 = arith.mulf %74, %76 : vector<32x256xf32>
    %78 = vector.extract_strided_slice %0 {offsets = [4, 0], sizes = [1, 256], strides = [1, 1]} : vector<9x256xf32> to vector<1x256xf32>
    %79 = vector.broadcast %78 : vector<1x256xf32> to vector<32x256xf32>
    %80 = arith.mulf %61, %79 : vector<32x256xf32>
    %c255_i32_16 = arith.constant 255 : i32
    %81 = tpu.dynamic_rotate %61 by %c255_i32_16 dim 1 : vector<32x256xf32>, i32 -> vector<32x256xf32>
    %82 = vector.extract_strided_slice %0 {offsets = [5, 0], sizes = [1, 256], strides = [1, 1]} : vector<9x256xf32> to vector<1x256xf32>
    %83 = vector.broadcast %82 : vector<1x256xf32> to vector<32x256xf32>
    %84 = arith.mulf %81, %83 : vector<32x256xf32>
    %c241_i32_17 = arith.constant 241 : i32
    %85 = tpu.dynamic_rotate %61 by %c241_i32_17 dim 1 : vector<32x256xf32>, i32 -> vector<32x256xf32>
    %86 = vector.extract_strided_slice %0 {offsets = [6, 0], sizes = [1, 256], strides = [1, 1]} : vector<9x256xf32> to vector<1x256xf32>
    %87 = vector.broadcast %86 : vector<1x256xf32> to vector<32x256xf32>
    %88 = arith.mulf %85, %87 : vector<32x256xf32>
    %c240_i32_18 = arith.constant 240 : i32
    %89 = tpu.dynamic_rotate %61 by %c240_i32_18 dim 1 : vector<32x256xf32>, i32 -> vector<32x256xf32>
    %90 = vector.extract_strided_slice %0 {offsets = [7, 0], sizes = [1, 256], strides = [1, 1]} : vector<9x256xf32> to vector<1x256xf32>
    %91 = vector.broadcast %90 : vector<1x256xf32> to vector<32x256xf32>
    %92 = arith.mulf %89, %91 : vector<32x256xf32>
    %c239_i32_19 = arith.constant 239 : i32
    %93 = tpu.dynamic_rotate %61 by %c239_i32_19 dim 1 : vector<32x256xf32>, i32 -> vector<32x256xf32>
    %94 = vector.extract_strided_slice %0 {offsets = [8, 0], sizes = [1, 256], strides = [1, 1]} : vector<9x256xf32> to vector<1x256xf32>
    %95 = vector.broadcast %94 : vector<1x256xf32> to vector<32x256xf32>
    %96 = arith.mulf %93, %95 : vector<32x256xf32>
    %97 = tpu.concatenate %65, %69, %73, %77, %80, %84, %88, %92, %96 in 0 : vector<32x256xf32>, vector<32x256xf32>, vector<32x256xf32>, vector<32x256xf32>, vector<32x256xf32>, vector<32x256xf32>, vector<32x256xf32>, vector<32x256xf32>, vector<32x256xf32> -> vector<288x256xf32>
    %c0_20 = arith.constant 0 : index
    %c0_21 = arith.constant 0 : index
    %98 = vector.load %arg5[%c0_20, %c0_21] : memref<2x288xf32, #tpu.memory_space<vmem>>, vector<2x288xf32>
    %cst_22 = arith.constant dense<0.000000e+00> : vector<2x256xf32>
    %99 = tpu.matmul %98, %97, %cst_22 {dimension_numbers = #tpu.dot_dimension_numbers<[1], [0], [0], [1], [0, 0, 1, 1], [], []>} : vector<2x288xf32>, vector<288x256xf32>, vector<2x256xf32> -> vector<2x256xf32>
    %c0_23 = arith.constant 0 : index
    %c0_24 = arith.constant 0 : index
    %100 = vector.load %arg6[%c0_23, %c0_24] : memref<2x1xf32, #tpu.memory_space<vmem>>, vector<2x1xf32>
    %101 = vector.broadcast %100 : vector<2x1xf32> to vector<2x256xf32>
    %102 = arith.addf %99, %101 : vector<2x256xf32>
    %c0_25 = arith.constant 0 : index
    %c0_26 = arith.constant 0 : index
    %c0_27 = arith.constant 0 : index
    %103 = vector.load %arg8[%c0_25, %c0_26, %c0_27] : memref<1x2x256xf32, #tpu.memory_space<vmem>>, vector<1x2x256xf32>
    %104 = vector.shape_cast %103 : vector<1x2x256xf32> to vector<2x256xf32>
    %105 = vector.shape_cast %102 : vector<2x256xf32> to vector<1x2x256xf32>
    tpu.vector_store %arg8[%c0_25, %c0_26, %c0_27], %105 {strides = array<i32>} : memref<1x2x256xf32, #tpu.memory_space<vmem>>, vector<1x2x256xf32>,
    %106 = vector.extract_strided_slice %102 {offsets = [0, 0], sizes = [1, 256], strides = [1, 1]} : vector<2x256xf32> to vector<1x256xf32>
    %107 = vector.extract_strided_slice %102 {offsets = [1, 0], sizes = [1, 256], strides = [1, 1]} : vector<2x256xf32> to vector<1x256xf32>
    %cst_28 = arith.constant 1.000000e+00 : f32
    %108 = vector.broadcast %cst_28 : f32 to vector<1x256xf32>
    %109 = arith.addf %106, %108 : vector<1x256xf32>
    %cst_29 = arith.constant 7.500000e+00 : f32
    %110 = vector.broadcast %cst_29 : f32 to vector<1x256xf32>
    %111 = arith.mulf %109, %110 : vector<1x256xf32>
    %cst_30 = arith.constant 1.000000e+00 : f32
    %112 = vector.broadcast %cst_30 : f32 to vector<1x256xf32>
    %113 = arith.addf %107, %112 : vector<1x256xf32>
    %cst_31 = arith.constant 7.500000e+00 : f32
    %114 = vector.broadcast %cst_31 : f32 to vector<1x256xf32>
    %115 = arith.mulf %113, %114 : vector<1x256xf32>
    %116 = math.floor %111 : vector<1x256xf32>
    %117 = math.floor %115 : vector<1x256xf32>
    %118 = arith.subf %111, %116 : vector<1x256xf32>
    %cst_32 = arith.constant 1.000000e+00 : f32
    %119 = vector.broadcast %cst_32 : f32 to vector<1x256xf32>
    %120 = arith.subf %119, %118 : vector<1x256xf32>
    %121 = arith.subf %115, %117 : vector<1x256xf32>
    %cst_33 = arith.constant 1.000000e+00 : f32
    %122 = vector.broadcast %cst_33 : f32 to vector<1x256xf32>
    %123 = arith.subf %122, %121 : vector<1x256xf32>
    %124 = arith.fptosi %116 : vector<1x256xf32> to vector<1x256xi32>
    %125 = arith.fptosi %117 : vector<1x256xf32> to vector<1x256xi32>
    %c1_i32_34 = arith.constant 1 : i32
    %126 = vector.broadcast %c1_i32_34 : i32 to vector<1x256xi32>
    %127 = arith.addi %124, %126 : vector<1x256xi32>
    %c1_i32_35 = arith.constant 1 : i32
    %128 = vector.broadcast %c1_i32_35 : i32 to vector<1x256xi32>
    %129 = arith.addi %125, %128 : vector<1x256xi32>
    %130 = tpu.iota {dimensions = array<i32: 0>} : vector<16x256xi32>
    %131 = vector.broadcast %124 : vector<1x256xi32> to vector<16x256xi32>
    %132 = arith.cmpi eq, %130, %131 : vector<16x256xi32>
    %cst_36 = arith.constant 0.000000e+00 : f32
    %133 = vector.shape_cast %120 : vector<1x256xf32> to vector<1x256xf32>
    %134 = vector.broadcast %133 : vector<1x256xf32> to vector<16x256xf32>
    %135 = vector.broadcast %cst_36 : f32 to vector<16x256xf32>
    %136 = arith.select %132, %134, %135 : vector<16x256xi1>, vector<16x256xf32>
    %137 = vector.broadcast %127 : vector<1x256xi32> to vector<16x256xi32>
    %138 = arith.cmpi eq, %130, %137 : vector<16x256xi32>
    %cst_37 = arith.constant 0.000000e+00 : f32
    %139 = vector.shape_cast %118 : vector<1x256xf32> to vector<1x256xf32>
    %140 = vector.broadcast %139 : vector<1x256xf32> to vector<16x256xf32>
    %141 = vector.broadcast %cst_37 : f32 to vector<16x256xf32>
    %142 = arith.select %138, %140, %141 : vector<16x256xi1>, vector<16x256xf32>
    %143 = arith.addf %136, %142 : vector<16x256xf32>
    %144 = tpu.iota {dimensions = array<i32: 0>} : vector<16x256xi32>
    %145 = vector.broadcast %125 : vector<1x256xi32> to vector<16x256xi32>
    %146 = arith.cmpi eq, %144, %145 : vector<16x256xi32>
    %cst_38 = arith.constant 0.000000e+00 : f32
    %147 = vector.shape_cast %123 : vector<1x256xf32> to vector<1x256xf32>
    %148 = vector.broadcast %147 : vector<1x256xf32> to vector<16x256xf32>
    %149 = vector.broadcast %cst_38 : f32 to vector<16x256xf32>
    %150 = arith.select %146, %148, %149 : vector<16x256xi1>, vector<16x256xf32>
    %151 = vector.broadcast %129 : vector<1x256xi32> to vector<16x256xi32>
    %152 = arith.cmpi eq, %144, %151 : vector<16x256xi32>
    %cst_39 = arith.constant 0.000000e+00 : f32
    %153 = vector.shape_cast %121 : vector<1x256xf32> to vector<1x256xf32>
    %154 = vector.broadcast %153 : vector<1x256xf32> to vector<16x256xf32>
    %155 = vector.broadcast %cst_39 : f32 to vector<16x256xf32>
    %156 = arith.select %152, %154, %155 : vector<16x256xi1>, vector<16x256xf32>
    %157 = arith.addf %150, %156 : vector<16x256xf32>
    %c0_40 = arith.constant 0 : index
    %c0_41 = arith.constant 0 : index
    %c0_42 = arith.constant 0 : index
    %158 = vector.load %arg2[%c0_40, %c0_41, %c0_42] : memref<1x64x16xf32, #tpu.memory_space<vmem>>, vector<1x64x16xf32>
    %159 = vector.shape_cast %158 : vector<1x64x16xf32> to vector<64x16xf32>
    %cst_43 = arith.constant dense<0.000000e+00> : vector<64x256xf32>
    %160 = tpu.matmul %159, %143, %cst_43 {dimension_numbers = #tpu.dot_dimension_numbers<[1], [0], [0], [1], [0, 0, 1, 1], [], []>} : vector<64x16xf32>, vector<16x256xf32>, vector<64x256xf32> -> vector<64x256xf32>
    %161 = vector.extract_strided_slice %160 {offsets = [0, 0], sizes = [16, 256], strides = [1, 1]} : vector<64x256xf32> to vector<16x256xf32>
    %162 = arith.mulf %157, %161 : vector<16x256xf32>
    %cst_44 = arith.constant dense<0.000000e+00> : vector<256xf32>
    %163 = vector.multi_reduction <add>, %162, %cst_44 [0] : vector<16x256xf32> to vector<256xf32>
    %164 = vector.shape_cast %163 : vector<256xf32> to vector<1x256xf32>
    %165 = vector.extract_strided_slice %160 {offsets = [16, 0], sizes = [16, 256], strides = [1, 1]} : vector<64x256xf32> to vector<16x256xf32>
    %166 = arith.mulf %157, %165 : vector<16x256xf32>
    %cst_45 = arith.constant dense<0.000000e+00> : vector<256xf32>
    %167 = vector.multi_reduction <add>, %166, %cst_45 [0] : vector<16x256xf32> to vector<256xf32>
    %168 = vector.shape_cast %167 : vector<256xf32> to vector<1x256xf32>
    %169 = vector.extract_strided_slice %160 {offsets = [32, 0], sizes = [16, 256], strides = [1, 1]} : vector<64x256xf32> to vector<16x256xf32>
    %170 = arith.mulf %157, %169 : vector<16x256xf32>
    %cst_46 = arith.constant dense<0.000000e+00> : vector<256xf32>
    %171 = vector.multi_reduction <add>, %170, %cst_46 [0] : vector<16x256xf32> to vector<256xf32>
    %172 = vector.shape_cast %171 : vector<256xf32> to vector<1x256xf32>
    %173 = vector.extract_strided_slice %160 {offsets = [48, 0], sizes = [16, 256], strides = [1, 1]} : vector<64x256xf32> to vector<16x256xf32>
    %174 = arith.mulf %157, %173 : vector<16x256xf32>
    %cst_47 = arith.constant dense<0.000000e+00> : vector<256xf32>
    %175 = vector.multi_reduction <add>, %174, %cst_47 [0] : vector<16x256xf32> to vector<256xf32>
    %176 = vector.shape_cast %175 : vector<256xf32> to vector<1x256xf32>
    %177 = tpu.concatenate %164, %168, %172, %176 in 0 : vector<1x256xf32>, vector<1x256xf32>, vector<1x256xf32>, vector<1x256xf32> -> vector<4x256xf32>
    %c0_48 = arith.constant 0 : index
    %c0_49 = arith.constant 0 : index
    %c0_50 = arith.constant 0 : index
    %178 = vector.load %arg7[%c0_48, %c0_49, %c0_50] : memref<1x4x256xf32, #tpu.memory_space<vmem>>, vector<1x4x256xf32>
    %179 = vector.shape_cast %178 : vector<1x4x256xf32> to vector<4x256xf32>
    %180 = vector.shape_cast %177 : vector<4x256xf32> to vector<1x4x256xf32>
    tpu.vector_store %arg7[%c0_48, %c0_49, %c0_50], %180 {strides = array<i32>} : memref<1x4x256xf32, #tpu.memory_space<vmem>>, vector<1x4x256xf32>,
    return
  }
  func.func @transform_0(%arg0: i32) -> (i32, i32, i32) {
    %c0_i32 = arith.constant 0 : i32
    %c0_i32_0 = arith.constant 0 : i32
    %c0_i32_1 = arith.constant 0 : i32
    return %arg0, %c0_i32, %c0_i32_0 : i32, i32, i32
  }
  func.func @transform_1(%arg0: i32) -> (i32, i32, i32) {
    %c0_i32 = arith.constant 0 : i32
    %c0_i32_0 = arith.constant 0 : i32
    %c0_i32_1 = arith.constant 0 : i32
    return %arg0, %c0_i32, %c0_i32_0 : i32, i32, i32
  }
  func.func @transform_2(%arg0: i32) -> (i32, i32) {
    %c0_i32 = arith.constant 0 : i32
    %c0_i32_0 = arith.constant 0 : i32
    %c0_i32_1 = arith.constant 0 : i32
    return %c0_i32, %c0_i32_0 : i32, i32
  }
  func.func @transform_3(%arg0: i32) -> (i32, i32) {
    %c0_i32 = arith.constant 0 : i32
    %c0_i32_0 = arith.constant 0 : i32
    %c0_i32_1 = arith.constant 0 : i32
    return %c0_i32, %c0_i32_0 : i32, i32
  }
  func.func @transform_4(%arg0: i32) -> (i32, i32) {
    %c0_i32 = arith.constant 0 : i32
    %c0_i32_0 = arith.constant 0 : i32
    %c0_i32_1 = arith.constant 0 : i32
    return %c0_i32, %c0_i32_0 : i32, i32
  }
  func.func @transform_5(%arg0: i32) -> (i32, i32) {
    %c0_i32 = arith.constant 0 : i32
    %c0_i32_0 = arith.constant 0 : i32
    %c0_i32_1 = arith.constant 0 : i32
    return %c0_i32, %c0_i32_0 : i32, i32
  }
  func.func @transform_6(%arg0: i32) -> (i32, i32, i32) {
    %c0_i32 = arith.constant 0 : i32
    %c0_i32_0 = arith.constant 0 : i32
    %c0_i32_1 = arith.constant 0 : i32
    return %arg0, %c0_i32, %c0_i32_0 : i32, i32, i32
  }
  func.func @transform_7(%arg0: i32) -> (i32, i32, i32) {
    %c0_i32 = arith.constant 0 : i32
    %c0_i32_0 = arith.constant 0 : i32
    %c0_i32_1 = arith.constant 0 : i32
    return %arg0, %c0_i32, %c0_i32_0 : i32, i32, i32
  }
}

</mosaic_0001>

<bundles_post_ra>
// kernel: dense_motion_forward.1
= control target key start
LH: loop header
LB: loop body
LE: loop exit
PB: predicated region body
PF: predicated region fallthrough
CT: control target
= control target key end

     0   :  { %s1778_s24 = smov 0   ;;  %s2580_s0 = inlined_call_operand.vmem [shape: f32[2,4,256], index: 0, kind: input, shape index: {}]   ;;  %s2581_s1 = inlined_call_operand.vmem [shape: f32[2,64,16], index: 1, kind: input, shape index: {}]   ;;  %s2582_s2 = inlined_call_operand.vmem [shape: f32[9,256], index: 2, kind: input, shape index: {}]   ;;  %s2583_s3 = inlined_call_operand.vmem [shape: bf16[32,36], index: 3, kind: input, shape index: {}]   ;;  %s2584_s4 = inlined_call_operand.vmem [shape: f32[2,288], index: 4, kind: input, shape index: {}]   ;;  %s2585_s5 = inlined_call_operand.vmem [shape: f32[2,1], index: 5, kind: input, shape index: {}]   ;;  %s2586_s6 = inlined_call_operand.vmem [shape: f32[2,4,256], index: 6, kind: output, shape index: {0}]   ;;  %s2587_s7 = inlined_call_operand.vmem [shape: f32[2,2,256], index: 7, kind: output, shape index: {1}]  }
   0x1 LB: > { %s1567_s25 = sadd.s32 4294967295, %s1725_s24   ;;  %p1571_p0 = scmp.ge.s32.totalorder %s1725_s24, 1  ;;  %s1725_s24 = sphi %s1778_s24, %s18_s24  }
   0x2   : > { %p250_p1 = scmp.lt.s32.totalorder %s1725_s24, 3 }
   0x4   : > { %p251_p2 = pnand %p1571_p0, %p250_p1 }
   0x6   : > { %254 = sbr.rel (%p251_p2) target bundleno = 1450 (0x5aa), region = 44 }
   0xd   : > { %p292_p3 = scmp.lt.s32.totalorder %s1567_s25, 1  ;;  %s1727_s30 = smov 1   ;;  %v1733_v2 = vmov 0   ;;  %v325_v3 = vlaneseq  ;;  %v1832_v9 = vld [vmem:[%s2582_s2] sm:$0xff]  ;;  %v1837_v10 = vld [vmem:[%s2582_s2 + $0x8] sm:$0xff]  ;;  %vm499_vm4 = vcmask 1043456  }
   0xe   : > { %s1728_s8 = smov 16   ;;  %s1729_s9 = smov 17   ;;  %574 = vmatprep.mubr.bf16.mxu0 %v1733_v2  ;;  %1706 = vset.pattern.permute.xlu0 %v1733_v2  ;;  %vm535_vm9 = vcmask 1041408   ;;  %vm528_vm10 = vcmask 293888   ;;  %vm958_vm11 = vcmask 261120  }
   0xf   : > { %s2639_s25 = smov (!%p292_p3, %s1567_s25), 1  ;;  %s1730_s10 = smov 15   ;;  %v1824_v4 = vshrl.u32 %v325_v3, 7  ;;  %v1826_v5 = vand.u32 127, %v325_v3 }
  0x10   : > { %s1599_s26 = sshll.u32 %s2639_s25, 3  ;;  %s1731_s11 = smov 127  }
  0x11   : > { %s296_s29 = scalar_lea.vmem %s2580_s0, %s1599_s26  ;;  %s1732_s12 = smov 112   ;;  %2606 = vst [vmem:[#allocation2_spill] sm:$0xff] %v1824_v4  ;;  %v383_v8 = vsub.s32 3, %v1824_v4  ;;  %v1840_v11 = vsub.s32 1, %v1824_v4  ;;  %vm378_vm0 = vcmp.lt.s32.totalorder %v1826_v5, 1  ;;  %v1844_v14 = vsub.s32 0, %v1824_v4 }
  0x12   : > { %v1794_v0 = vld [vmem:[%s296_s29] sm:$0xff]  ;;  %s1734_s13 = smov 113   ;;  %s1735_s14 = smov 111   ;;  %v366_v15 = vsub.s32 2, %v1824_v4  ;;  %vm344_vm1 = vcmp.lt.s32.totalorder %v1826_v5, 16  ;;  %vm327_vm2 = vcmp.lt.s32.totalorder %v1826_v5, 17 }
  0x13   : > { %374 = vrot.lane.b32.xlu1 %v1794_v0, %s1727_s30  ;;  %340 = vrot.lane.b32.xlu0 %v1794_v0, %s1728_s8  ;;  %v319_v1 = vcombine.high %v1794_v0, %v1794_v0  ;;  %2607 = vst [vmem:[#allocation3_spill] sm:$0xff] %v1840_v11  ;;  %2608 = vst [vmem:[#allocation4_spill] sm:$0xff] %v1844_v14  ;;  %v1848_v16 = vrot.slane %v1832_v9, %v383_v8  ;;  %vm361_vm3 = vcmp.lt.s32.totalorder %v1826_v5, 15  ;;  %s1600_s15 = sshll.u32 %s2639_s25, 6  ;;  %s306_s21 = scalar_lea.vmem %s2586_s6, %s1599_s26 }
  0x14   : > { %v1851_v17 = vrot.slane %v1837_v10, %v383_v8  ;;  %v1860_v20 = vrot.slane %v1832_v9, %v1840_v11  ;;  %v1864_v21 = vrot.slane %v1837_v10, %v1840_v11  ;;  %v393_v22 = vsub.s32 4, %v1824_v4  ;;  %s2513_s18 = scalar_lea.vmem %s2581_s1, %s1600_s15 }
  0x15   : > { %v1871_v23 = vrot.slane %v1832_v9, %v1844_v14  ;;  %v1875_v24 = vrot.slane %v1837_v10, %v1844_v14  ;;  %v1878_v27 = vrot.slane %v1832_v9, %v366_v15  ;;  %v413_v28 = vsub.s32 5, %v1824_v4 }
  0x16   : > { %v1890_v35 = vrot.slane %v1837_v10, %v366_v15  ;;  %v1897_v38 = vrot.slane %v1832_v9, %v393_v22  ;;  %v1900_v39 = vrot.slane %v1837_v10, %v393_v22  ;;  %vm408_vm5 = vcmp.lt.s32.totalorder %v1826_v5, 127 }
  0x17   : > { %321 = vrot.lane.b32.xlu0 %v1794_v0, %s1729_s9  ;;  %376 = vrot.lane.b32.xlu1 %v319_v1, %s1727_s30  ;;  %v447_v44 = vsub.s32 7, %v1824_v4  ;;  %v1913_v53 = vrot.slane %v1832_v9, %v413_v28  ;;  %v1916_v54 = vrot.slane %v1837_v10, %v413_v28  ;;  %vm442_vm6 = vcmp.lt.s32.totalorder %v1826_v5, 112 }
  0x18   : > { %v401_v55 = vcombine.low %v1897_v38, %v1900_v39  ;;  %v430_v8 = vsub.s32 6, %v1824_v4  ;;  %vm425_vm7 = vcmp.lt.s32.totalorder %v1826_v5, 113  ;;  %vm459_vm8 = vcmp.lt.s32.totalorder %v1826_v5, 111 }
  0x1b   : > { %323 = vrot.lane.b32.xlu1 %v319_v1, %s1729_s9  ;;  %342 = vrot.lane.b32.xlu0 %v319_v1, %s1728_s8 }
  0x1f   : > { %359 = vrot.lane.b32.xlu1 %v319_v1, %s1730_s10  ;;  %357 = vrot.lane.b32.xlu0 %v1794_v0, %s1730_s10 }
  0x23   : > { %406 = vrot.lane.b32.xlu1 %v319_v1, %s1731_s11  ;;  %404 = vrot.lane.b32.xlu0 %v1794_v0, %s1731_s11 }
  0x27   : > { %440 = vrot.lane.b32.xlu1 %v319_v1, %s1732_s12  ;;  %438 = vrot.lane.b32.xlu0 %v1794_v0, %s1732_s12 }
  0x2b   : > { %423 = vrot.lane.b32.xlu1 %v319_v1, %s1734_s13  ;;  %421 = vrot.lane.b32.xlu0 %v1794_v0, %s1734_s13 }
  0x2f   : > { %457 = vrot.lane.b32.xlu1 %v319_v1, %s1735_s14  ;;  %455 = vrot.lane.b32.xlu0 %v1794_v0, %s1735_s14 }
  0x85   : > { %v375_v6 = vpop.permute.xlu1 %374  ;;  %v341_v7 = vpop.permute.xlu0 %340 }
  0x89   : > { %v322_v12 = vpop.permute.xlu0 %321  ;;  %v377_v13 = vpop.permute.xlu1 %376 }
  0x8a   : > { %v379_v18 = vsel %vm378_vm0, %v375_v6, %v377_v13  ;;  %v380_v19 = vsel %vm378_vm0, %v377_v13, %v375_v6  ;;  %v1930_v6 = vrot.slane %v1832_v9, %v447_v44 }
  0x8b   : > { %v389_v29 = vmul.f32 %v1848_v16, %v380_v19  ;;  %v390_v30 = vmul.f32 %v1851_v17, %v379_v18  ;;  %v403_v19 = vmul.f32 %v401_v55, %v1794_v0 }
  0x8c   : > { %2609 = vst [vmem:[#allocation5_spill] sm:$0xff] %v1930_v6 }
  0x8d   : > { %v324_v25 = vpop.permute.xlu1 %323  ;;  %v343_v26 = vpop.permute.xlu0 %342  ;;  %v480_v45 = vrot.slane %v389_v29, 4  ;;  %v481_v46 = vrot.slane %v390_v30, 4  ;;  %v1947_v29 = vrot.slane %v1832_v9, %v430_v8  ;;  %v1950_v30 = vrot.slane %v1837_v10, %v430_v8 }
  0x8e   : > { %v345_v31 = vsel %vm344_vm1, %v341_v7, %v343_v26  ;;  %v346_v32 = vsel %vm344_vm1, %v343_v26, %v341_v7  ;;  %v328_v36 = vsel %vm327_vm2, %v322_v12, %v324_v25  ;;  %v329_v37 = vsel %vm327_vm2, %v324_v25, %v322_v12 }
  0x8f   : > { %v355_v33 = vmul.f32 %v1860_v20, %v346_v32  ;;  %v356_v34 = vmul.f32 %v1864_v21, %v345_v31  ;;  %v338_v49 = vmul.f32 %v1871_v23, %v329_v37  ;;  %v339_v50 = vmul.f32 %v1875_v24, %v328_v36  ;;  %2610 = vst [vmem:[#allocation6_spill] sm:$0xff] %v1947_v29 }
  0x90   : > { %v1933_v7 = vrot.slane %v1837_v10, %v447_v44 }
  0x91   : > { %v474_v40 = vrot.slane %v355_v33, 4  ;;  %v475_v41 = vrot.slane %v356_v34, 4  ;;  %v360_v42 = vpop.permute.xlu1 %359  ;;  %v358_v43 = vpop.permute.xlu0 %357  ;;  %v485_v34 = vcombine.high %v403_v19, %v403_v19 }
  0x92   : > { %v362_v47 = vsel %vm361_vm3, %v358_v43, %v360_v42  ;;  %v363_v48 = vsel %vm361_vm3, %v360_v42, %v358_v43  ;;  %v1962_v42 = vld [vmem:[%s2582_s2 + $0x10] ss:$0 sm:$0xff]  ;;  %v1967_v43 = vld [vmem:[%s2582_s2 + $0x18] ss:$0 sm:$0xff] }
  0x93   : > { %v372_v51 = vmul.f32 %v1878_v27, %v363_v48  ;;  %v373_v52 = vmul.f32 %v1890_v35, %v362_v47  ;;  %v501_v58 = vsel %vm499_vm4, %v339_v50, %v475_v41  ;;  %v500_v60 = vsel %vm499_vm4, %v338_v49, %v474_v40 }
  0x95   : > { %v407_v56 = vpop.permute.xlu1 %406  ;;  %v405_v57 = vpop.permute.xlu0 %404  ;;  %v503_v59 = vsel %vm499_vm4, %v373_v52, %v481_v46  ;;  %v502_v61 = vsel %vm499_vm4, %v372_v51, %v480_v45 }
  0x96   : > { %v409_v62 = vsel %vm408_vm5, %v405_v57, %v407_v56  ;;  %v410_v63 = vsel %vm408_vm5, %v407_v56, %v405_v57  ;;  %v509_v1 = vpack.c.bf16 %v503_v59, %v501_v58  ;;  %v508_v3 = vpack.c.bf16 %v502_v61, %v500_v60  ;;  %v1708_v61 = vld [vmem:[%s2583_s3] sm:$0xff]  }
  0x97   : > { %v419_v12 = vmul.f32 %v1913_v53, %v409_v62  ;;  %v420_v13 = vmul.f32 %v1916_v54, %v410_v63  ;;  %v1709_v62 = vld [vmem:[%s2583_s3 + $0x8] sm:$0xff]  }
  0x98   : > { %542 = vmatprep.subr.bf16.mxu0 %v509_v1 }
  0x99   : > { %v441_v15 = vpop.permute.xlu1 %440  ;;  %543 = vmatpush1.bf16.msra.mxu0 %v508_v3  ;;  %v439_v18 = vpop.permute.xlu0 %438  ;;  %v489_v31 = vrot.slane %v419_v12, 4  ;;  %v490_v0 = vrot.slane %v420_v13, 4 }
  0x9a   : > { %v443_v22 = vsel %vm442_vm6, %v439_v18, %v441_v15  ;;  %v444_v25 = vsel %vm442_vm6, %v441_v15, %v439_v18 }
  0x9b   : > { %v453_v26 = vmul.f32 %v1930_v6, %v443_v22  ;;  %v454_v28 = vmul.f32 %v1933_v7, %v444_v25  ;;  %v505_v46 = vsel %vm499_vm4, %v485_v34, %v490_v0  ;;  %v504_v48 = vsel %vm499_vm4, %v403_v19, %v489_v31 }
  0x9d   : > { %v424_v32 = vpop.permute.xlu1 %423  ;;  %v422_v33 = vpop.permute.xlu0 %421  ;;  %v495_v40 = vrot.slane %v453_v26, 4  ;;  %v496_v41 = vrot.slane %v454_v28, 4 }
  0x9e   : > { %v426_v36 = vsel %vm425_vm7, %v422_v33, %v424_v32  ;;  %v427_v37 = vsel %vm425_vm7, %v424_v32, %v422_v33 }
  0x9f   : > { %v436_v9 = vmul.f32 %v1947_v29, %v426_v36  ;;  %v437_v10 = vmul.f32 %v1950_v30, %v427_v37 }
  0xa1   : > { %v458_v44 = vpop.permute.xlu1 %457  ;;  %v456_v45 = vpop.permute.xlu0 %455  ;;  %v507_v47 = vsel %vm499_vm4, %v437_v10, %v496_v41  ;;  %v506_v49 = vsel %vm499_vm4, %v436_v9, %v495_v40 }
  0xa2   : > { %v460_v50 = vsel %vm459_vm8, %v456_v45, %v458_v44  ;;  %v461_v51 = vsel %vm459_vm8, %v458_v44, %v456_v45  ;;  %v511_v52 = vpack.c.bf16 %v507_v47, %v505_v46  ;;  %v510_v55 = vpack.c.bf16 %v506_v49, %v504_v48 }
  0xa3   : > { %v470_v56 = vmul.f32 %v1962_v42, %v460_v50  ;;  %v471_v57 = vmul.f32 %v1967_v43, %v461_v51 }
  0xa4   : > { %544 = vmatprep.subr.bf16.mxu0 %v511_v52 }
  0xa5   : > { %v512_v58 = vpack.c.bf16 %v470_v56, %v470_v56  ;;  %v513_v59 = vpack.c.bf16 %v471_v57, %v471_v57  ;;  %545 = vmatpush1.bf16.msra.mxu0 %v510_v55 }
  0xa7   : > { %1584 = vmatprep.subr.msk.bf16.mxu0 %vm535_vm9, %v513_v59  ;;  %v537_v60 = vsel %vm535_vm9, %v512_v58, 0 }
  0xa9   : > { %547 = vmatpush1.bf16.msra.mxu0 %v537_v60 }
  0xac   : > { %1585 = vmatmul.mubr.msk.bf16.vlgmr.msra.gmra.mrb[0].mxu0 %vm528_vm10, %v1708_v61 }
  0xad   : > { %584 = vmatprep.mubr.bf16.mxu0 %v1733_v2 }
  0xb4   : > { %1586 = vmatmul.mubr.msk.bf16.gmra.mrb[4].mxu0 %vm528_vm10, %v1709_v62 }
 0x17f   : > { %v576_v63 = vpop.f32.mrb[0].mxu0 }
 0x180   : > { %v578_v1 = vpop.f32.mrb[1].mxu0 }
 0x181   : > { %v580_v3 = vpop.f32.mrb[2].mxu0  ;;  %v595_v8 = vadd.f32 %v578_v1, %v576_v63 }
 0x182   : > { %v582_v12 = vpop.f32.mrb[3].mxu0 }
 0x183   : > { %596 = vadd.xlane.f32.xlu0 %v595_v8  ;;  %v598_v13 = vadd.f32 %v582_v12, %v580_v3 }
 0x185   : > { %599 = vadd.xlane.f32.xlu1 %v598_v13 }
 0x187   : > { %v586_v15 = vpop.f32.mrb[4].mxu0 }
 0x188   : > { %v588_v18 = vpop.f32.mrb[5].mxu0 }
 0x189   : > { %v601_v19 = vadd.f32 %v588_v18, %v586_v15  ;;  %v590_v22 = vpop.f32.mrb[6].mxu0 }
 0x18a   : > { %v592_v25 = vpop.f32.mrb[7].mxu0 }
 0x18b   : > { %602 = vadd.xlane.f32.xlu0 %v601_v19  ;;  %v604_v2 = vadd.f32 %v592_v25, %v590_v22 }
 0x18f   : > { %605 = vadd.xlane.f32.xlu0 %v604_v2 }
 0x210   : > { %v597_v26 = vpop.xlane.xlu0 %596 }
 0x211   : > { %v608_v28 = vmul.f32 0.00390625, %v597_v26 }
 0x212   : > { %v600_v31 = vpop.xlane.xlu1 %599 }
 0x213   : > { %v612_v0 = vsub.f32 %v576_v63, %v608_v28  ;;  %v613_v32 = vsub.f32 %v578_v1, %v608_v28  ;;  %v609_v33 = vmul.f32 0.00390625, %v600_v31 }
 0x215   : > { %v614_v34 = vsub.f32 %v580_v3, %v609_v33  ;;  %v615_v36 = vsub.f32 %v582_v12, %v609_v33  ;;  %v620_v37 = vmul.f32 %v612_v0, %v612_v0  ;;  %v621_v40 = vmul.f32 %v613_v32, %v613_v32 }
 0x217   : > { %v628_v41 = vadd.f32 %v621_v40, %v620_v37  ;;  %v622_v9 = vmul.f32 %v614_v34, %v614_v34  ;;  %v623_v10 = vmul.f32 %v615_v36, %v615_v36 }
 0x218   : > { %v603_v44 = vpop.xlane.xlu0 %602 }
 0x219   : > { %v610_v45 = vmul.f32 0.00390625, %v603_v44  ;;  %629 = vadd.xlane.f32.xlu1 %v628_v41  ;;  %v631_v46 = vadd.f32 %v623_v10, %v622_v9 }
 0x21b   : > { %v1988_v47 = vsub.f32 %v586_v15, %v610_v45  ;;  %v1990_v48 = vsub.f32 %v588_v18, %v610_v45  ;;  %632 = vadd.xlane.f32.xlu0 %v631_v46 }
 0x21c   : > { %v606_v49 = vpop.xlane.xlu0 %605 }
 0x21d   : > { %v611_v50 = vmul.f32 0.00390625, %v606_v49  ;;  %v624_v51 = vmul.f32 %v1988_v47, %v1988_v47  ;;  %v625_v52 = vmul.f32 %v1990_v48, %v1990_v48 }
 0x21f   : > { %v1996_v55 = vsub.f32 %v590_v22, %v611_v50  ;;  %v1998_v56 = vsub.f32 %v592_v25, %v611_v50  ;;  %v634_v57 = vadd.f32 %v625_v52, %v624_v51  ;;  %v1736_v52 = vmov 1983009808  }
 0x221   : > { %635 = vadd.xlane.f32.xlu1 %v634_v57  ;;  %v626_v58 = vmul.f32 %v1996_v55, %v1996_v55  ;;  %v627_v59 = vmul.f32 %v1998_v56, %v1998_v56 }
 0x223   : > { %v637_v60 = vadd.f32 %v627_v59, %v626_v58 }
 0x225   : > { %638 = vadd.xlane.f32.xlu0 %v637_v60  ;;  %v932_v60 = vld [vmem:[%s2584_s4] sm:$0x3f] }
 0x2a6   : > { %v630_v61 = vpop.xlane.xlu1 %629 }
 0x2a7   : > { %v640_v62 = vmul.f32 0.00390625, %v630_v61 }
 0x2a8   : > { %v633_v63 = vpop.xlane.xlu0 %632 }
 0x2a9   : > { %v644_v1 = vadd.f32 1e-05, %v640_v62  ;;  %v641_v3 = vmul.f32 0.00390625, %v633_v63 }
 0x2ab   : > { %1711 = vrsqrt.f32 %v644_v1  ;;  %v645_v8 = vadd.f32 1e-05, %v641_v3 }
 0x2ad   : > { %1713 = vrsqrt.f32 %v645_v8  ;;  %v940_v8 = vcombine.high %v932_v60, %v932_v60 }
 0x2ae   : > { %v636_v33 = vpop.xlane.xlu1 %635 }
 0x2b2   : > { %v639_v37 = vpop.xlane.xlu0 %638 }
 0x2b3   : > { %v643_v40 = vmul.f32 0.00390625, %v639_v37 }
 0x2b5   : > { %v1712_v12 = vpop.eup %1711  ;;  %v647_v41 = vadd.f32 1e-05, %v643_v40 }
 0x2b6   : > { %v652_v13 = vmul.f32 %v1712_v12, %v612_v0  ;;  %v653_v18 = vmul.f32 %v1712_v12, %v613_v32 }
 0x2b7   : > { %v1714_v15 = vpop.eup %1713 }
 0x2b8   : > { %v660_v19 = vmax.f32 %v652_v13, 0.0  ;;  %v654_v22 = vmul.f32 %v1714_v15, %v614_v34  ;;  %v2006_v2 = vmax.f32 %v653_v18, 0.0  ;;  %v655_v26 = vmul.f32 %v1714_v15, %v615_v36 }
 0x2b9   : > { %v642_v34 = vmul.f32 0.00390625, %v636_v33  ;;  %v2588_v18 = vmov 0.0  }
 0x2ba   : > { %v662_v25 = vmax.f32 %v654_v22, 0.0  ;;  %668 = vrot.lane.b32.xlu1 %v660_v19, %s1729_s9  ;;  %700 = vrot.lane.b32.xlu0 %v660_v19, %s1728_s8  ;;  %v2012_v31 = vmul.f32 %v660_v19, %v1897_v38  ;;  %v2020_v32 = vmax.f32 %v655_v26, 0.0  ;;  %v933_v22 = vld [vmem:[%s2585_s5] sm:$0x3] }
 0x2bb   : > { %v646_v36 = vadd.f32 1e-05, %v642_v34  ;;  %1096 = vmatprep.mubr.f32.mxu0 %v2588_v18 }
 0x2bc   : > { %v2009_v28 = vmul.f32 %v662_v25, %v1897_v38 }
 0x2bd   : > { %1715 = vrsqrt.f32 %v646_v36 }
 0x2be   : > { %676 = vrot.lane.b32.xlu1 %v2006_v2, %s1729_s9  ;;  %708 = vrot.lane.b32.xlu0 %v2006_v2, %s1728_s8  ;;  %1717 = vrsqrt.f32 %v647_v41 }
 0x2c2   : > { %732 = vrot.lane.b32.xlu0 %v660_v19, %s1730_s10  ;;  %678 = vrot.lane.b32.xlu1 %v2020_v32, %s1729_s9 }
 0x2c6   : > { %740 = vrot.lane.b32.xlu0 %v2006_v2, %s1730_s10  ;;  %702 = vrot.lane.b32.xlu1 %v662_v25, %s1728_s8 }
 0x2c7   : > { %v1716_v9 = vpop.eup %1715 }
 0x2c8   : > { %v656_v10 = vmul.f32 %v1716_v9, %v1988_v47  ;;  %v657_v44 = vmul.f32 %v1716_v9, %v1990_v48  ;;  %v1718_v46 = vpop.eup %1717 }
 0x2c9   : > { %v658_v50 = vmul.f32 %v1718_v46, %v1996_v55  ;;  %v659_v47 = vmul.f32 %v1718_v46, %v1998_v56  ;;  %v942_v55 = vunpack.c.l.s4 %v1736_v52 }
 0x2ca   : > { %764 = vrot.lane.b32.xlu0 %v660_v19, %s1727_s30  ;;  %710 = vrot.lane.b32.xlu1 %v2020_v32, %s1728_s8  ;;  %v2059_v45 = vmax.f32 %v656_v10, 0.0  ;;  %v2065_v49 = vmax.f32 %v657_v44, 0.0 }
 0x2cb   : > { %v2072_v48 = vmax.f32 %v658_v50, 0.0  ;;  %v2078_v51 = vmax.f32 %v659_v47, 0.0  ;;  %v943_v56 = vunpack.c.0.s8 %v942_v55 }
 0x2cd   : > { %v946_v59 = vsub.s32 %v943_v56, %v1824_v4 }
 0x2ce   : > { %772 = vrot.lane.b32.xlu0 %v2006_v2, %s1727_s30  ;;  %734 = vrot.lane.b32.xlu1 %v662_v25, %s1730_s10 }
 0x2cf   : > { %v2138_v61 = vrot.slane %v932_v60, %v946_v59 }
 0x2d1   : > { %2611 = vst [vmem:[#allocation7_spill] sm:$0xff] %v2138_v61  ;;  %v955_v12 = vcombine.high %v2138_v61, %v2138_v61 }
 0x2d2   : > { %804 = vrot.lane.b32.xlu0 %v660_v19, %s1731_s11  ;;  %742 = vrot.lane.b32.xlu1 %v2020_v32, %s1730_s10 }
 0x2d3   : > { %1025 = vmatprep.mubr.f32.mxu1 %v955_v12 }
 0x2d6   : > { %812 = vrot.lane.b32.xlu0 %v2006_v2, %s1731_s11  ;;  %766 = vrot.lane.b32.xlu1 %v662_v25, %s1727_s30 }
 0x2da   : > { %836 = vrot.lane.b32.xlu0 %v660_v19, %s1734_s13  ;;  %774 = vrot.lane.b32.xlu1 %v2020_v32, %s1727_s30 }
 0x2de   : > { %844 = vrot.lane.b32.xlu0 %v2006_v2, %s1734_s13  ;;  %806 = vrot.lane.b32.xlu1 %v662_v25, %s1731_s11 }
 0x2e2   : > { %868 = vrot.lane.b32.xlu0 %v660_v19, %s1732_s12  ;;  %814 = vrot.lane.b32.xlu1 %v2020_v32, %s1731_s11 }
 0x2e6   : > { %876 = vrot.lane.b32.xlu0 %v2006_v2, %s1732_s12  ;;  %838 = vrot.lane.b32.xlu1 %v662_v25, %s1734_s13 }
 0x2ea   : > { %900 = vrot.lane.b32.xlu0 %v660_v19, %s1735_s14  ;;  %846 = vrot.lane.b32.xlu1 %v2020_v32, %s1734_s13  ;;  %v2157_v19 = vrot.slane %v940_v8, %v946_v59 }
 0x2ec   : > { %2612 = vst [vmem:[#allocation8_spill] sm:$0xff] %v2157_v19 }
 0x2ee   : > { %870 = vrot.lane.b32.xlu1 %v662_v25, %s1732_s12  ;;  %670 = vrot.lane.b32.xlu0 %v662_v25, %s1729_s9 }
 0x2f2   : > { %878 = vrot.lane.b32.xlu1 %v2020_v32, %s1732_s12  ;;  %672 = vrot.lane.b32.xlu0 %v2059_v45, %s1729_s9 }
 0x2f3   : > { %v2633_v5 = vld [vmem:[#allocation8_spill] sm:$0xff] }
 0x2f6   : > { %902 = vrot.lane.b32.xlu1 %v662_v25, %s1735_s14  ;;  %680 = vrot.lane.b32.xlu0 %v2065_v49, %s1729_s9 }
 0x2fa   : > { %704 = vrot.lane.b32.xlu0 %v2059_v45, %s1728_s8  ;;  %674 = vrot.lane.b32.xlu1 %v2072_v48, %s1729_s9 }
 0x2fe   : > { %712 = vrot.lane.b32.xlu0 %v2065_v49, %s1728_s8  ;;  %682 = vrot.lane.b32.xlu1 %v2078_v51, %s1729_s9 }
 0x302   : > { %736 = vrot.lane.b32.xlu0 %v2059_v45, %s1730_s10  ;;  %706 = vrot.lane.b32.xlu1 %v2072_v48, %s1728_s8 }
 0x306   : > { %744 = vrot.lane.b32.xlu0 %v2065_v49, %s1730_s10  ;;  %714 = vrot.lane.b32.xlu1 %v2078_v51, %s1728_s8 }
 0x30a   : > { %768 = vrot.lane.b32.xlu0 %v2059_v45, %s1727_s30  ;;  %738 = vrot.lane.b32.xlu1 %v2072_v48, %s1730_s10 }
 0x30e   : > { %776 = vrot.lane.b32.xlu0 %v2065_v49, %s1727_s30  ;;  %746 = vrot.lane.b32.xlu1 %v2078_v51, %s1730_s10 }
 0x312   : > { %908 = vrot.lane.b32.xlu0 %v2006_v2, %s1735_s14  ;;  %770 = vrot.lane.b32.xlu1 %v2072_v48, %s1727_s30 }
 0x316   : > { %808 = vrot.lane.b32.xlu0 %v2059_v45, %s1731_s11  ;;  %778 = vrot.lane.b32.xlu1 %v2078_v51, %s1727_s30 }
 0x31a   : > { %816 = vrot.lane.b32.xlu0 %v2065_v49, %s1731_s11  ;;  %910 = vrot.lane.b32.xlu1 %v2020_v32, %s1735_s14 }
 0x31e   : > { %840 = vrot.lane.b32.xlu0 %v2059_v45, %s1734_s13  ;;  %810 = vrot.lane.b32.xlu1 %v2072_v48, %s1731_s11 }
 0x322   : > { %848 = vrot.lane.b32.xlu0 %v2065_v49, %s1734_s13  ;;  %818 = vrot.lane.b32.xlu1 %v2078_v51, %s1731_s11  ;;  %s1602_s11 = sshll.u32 %s2639_s25, 2 }
 0x326   : > { %872 = vrot.lane.b32.xlu0 %v2059_v45, %s1732_s12  ;;  %842 = vrot.lane.b32.xlu1 %v2072_v48, %s1734_s13 }
 0x32a   : > { %880 = vrot.lane.b32.xlu0 %v2065_v49, %s1732_s12  ;;  %850 = vrot.lane.b32.xlu1 %v2078_v51, %s1734_s13 }
 0x32c   : > { %v2128_v57 = vpop.permute.xlu1 %668  ;;  %v701_v58 = vpop.permute.xlu0 %700 }
 0x32e   : > { %904 = vrot.lane.b32.xlu0 %v2059_v45, %s1735_s14  ;;  %874 = vrot.lane.b32.xlu1 %v2072_v48, %s1732_s12 }
 0x330   : > { %v2140_v62 = vpop.permute.xlu1 %676  ;;  %v709_v63 = vpop.permute.xlu0 %708 }
 0x331   : > { %v2144_v1 = vsel %vm344_vm1, %v701_v58, %v709_v63  ;;  %v2148_v3 = vsel %vm344_vm1, %v709_v63, %v701_v58 }
 0x332   : > { %912 = vrot.lane.b32.xlu0 %v2065_v49, %s1735_s14  ;;  %882 = vrot.lane.b32.xlu1 %v2078_v51, %s1732_s12 }
 0x334   : > { %v679_v13 = vpop.permute.xlu1 %678  ;;  %v733_v15 = vpop.permute.xlu0 %732 }
 0x336   : > { %906 = vrot.lane.b32.xlu1 %v2072_v48, %s1735_s14  ;;  %936 = vperm.xlu0 %1706, %v933_v22  }
 0x338   : > { %v2164_v25 = vpop.permute.xlu1 %702  ;;  %v741_v26 = vpop.permute.xlu0 %740 }
 0x339   : > { %v2168_v33 = vsel %vm361_vm3, %v733_v15, %v741_v26  ;;  %v2172_v34 = vsel %vm361_vm3, %v741_v26, %v733_v15 }
 0x33a   : > { %914 = vrot.lane.b32.xlu1 %v2078_v51, %s1735_s14  ;;  %s311_s14 = scalar_lea.vmem %s2587_s7, %s1602_s11 }
 0x33c   : > { %v2176_v36 = vpop.permute.xlu1 %710  ;;  %v765_v37 = vpop.permute.xlu0 %764 }
 0x340   : > { %v2178_v40 = vpop.permute.xlu1 %734  ;;  %v773_v41 = vpop.permute.xlu0 %772 }
 0x341   : > { %v2182_v9 = vsel %vm378_vm0, %v765_v37, %v773_v41  ;;  %v2186_v10 = vsel %vm378_vm0, %v773_v41, %v765_v37 }
 0x344   : > { %v2188_v44 = vpop.permute.xlu1 %742  ;;  %v805_v46 = vpop.permute.xlu0 %804 }
 0x348   : > { %v2190_v50 = vpop.permute.xlu1 %766  ;;  %v813_v47 = vpop.permute.xlu0 %812 }
 0x349   : > { %v820_v52 = vsel %vm408_vm5, %v805_v46, %v813_v47  ;;  %v824_v55 = vsel %vm408_vm5, %v813_v47, %v805_v46 }
 0x34a   : > { %v2207_v37 = vmul.f32 %v820_v52, %v1913_v53  ;;  %v2210_v41 = vmul.f32 %v824_v55, %v1916_v54 }
 0x34c   : > { %v2196_v56 = vpop.permute.xlu1 %774  ;;  %v837_v58 = vpop.permute.xlu0 %836 }
 0x350   : > { %v807_v59 = vpop.permute.xlu1 %806  ;;  %v845_v60 = vpop.permute.xlu0 %844 }
 0x351   : > { %v852_v63 = vsel %vm425_vm7, %v837_v58, %v845_v60  ;;  %v856_v8 = vsel %vm425_vm7, %v845_v60, %v837_v58 }
 0x352   : > { %v2233_v18 = vmul.f32 %v852_v63, %v1947_v29  ;;  %v688_v63 = vsel %vm327_vm2, %v2140_v62, %v2128_v57 }
 0x353   : > { %v692_v4 = vmul.f32 %v688_v63, %v1871_v23 }
 0x354   : > { %v815_v12 = vpop.permute.xlu1 %814  ;;  %v869_v15 = vpop.permute.xlu0 %868  ;;  %2613 = vst [vmem:[#allocation9_spill] sm:$0xff] %v2233_v18 }
 0x355   : > { %v821_v22 = vsel %vm408_vm5, %v807_v59, %v815_v12  ;;  %v825_v26 = vsel %vm408_vm5, %v815_v12, %v807_v59  ;;  %v2236_v59 = vmul.f32 %v856_v8, %v1950_v30 }
 0x356   : > { %v2213_v46 = vmul.f32 %v821_v22, %v1913_v53  ;;  %v2216_v47 = vmul.f32 %v825_v26, %v1916_v54 }
 0x357   : > { %2614 = vst [vmem:[#allocation10_spill] sm:$0xff] %v2236_v59 }
 0x358   : > { %v839_v58 = vpop.permute.xlu1 %838  ;;  %v877_v60 = vpop.permute.xlu0 %876 }
 0x359   : > { %v884_v52 = vsel %vm442_vm6, %v869_v15, %v877_v60  ;;  %v888_v55 = vsel %vm442_vm6, %v877_v60, %v869_v15  ;;  %v684_v60 = vsel %vm327_vm2, %v2128_v57, %v2140_v62 }
 0x35a   : > { %v693_v57 = vmul.f32 %v684_v60, %v1875_v24  ;;  %v2272_v63 = vmul.f32 %v888_v55, %v1933_v7 }
 0x35c   : > { %v847_v12 = vpop.permute.xlu1 %846  ;;  %v2226_v22 = vpop.permute.xlu0 %900  ;;  %2616 = vst [vmem:[#allocation12_spill] sm:$0xff] %v2272_v63 }
 0x35d   : > { %v853_v26 = vsel %vm425_vm7, %v839_v58, %v847_v12  ;;  %v857_v0 = vsel %vm425_vm7, %v847_v12, %v839_v58 }
 0x35e   : > { %v2239_v11 = vmul.f32 %v853_v26, %v1947_v29  ;;  %v2242_v15 = vmul.f32 %v857_v0, %v1950_v30 }
 0x360   : > { %v871_v58 = vpop.permute.xlu1 %870  ;;  %v671_v12 = vpop.permute.xlu0 %670 }
 0x361   : > { %v685_v0 = vsel %vm327_vm2, %v671_v12, %v679_v13  ;;  %v689_v14 = vsel %vm327_vm2, %v679_v13, %v671_v12  ;;  %v2269_v13 = vmul.f32 %v884_v52, %v1930_v6  ;;  %v717_v12 = vsel %vm344_vm1, %v2164_v25, %v2176_v36 }
 0x362   : > { %v694_v19 = vmul.f32 %v689_v14, %v1871_v23  ;;  %v695_v62 = vmul.f32 %v685_v0, %v1875_v24  ;;  %v721_v0 = vsel %vm344_vm1, %v2176_v36, %v2164_v25 }
 0x363   : > { %2615 = vst [vmem:[#allocation11_spill] sm:$0xff] %v2269_v13  ;;  %v726_v25 = vmul.f32 %v721_v0, %v1860_v20 }
 0x364   : > { %v879_v61 = vpop.permute.xlu1 %878  ;;  %v673_v29 = vpop.permute.xlu0 %672  ;;  %v1603_v8 = vpack.c.bf16 %v695_v62, %v693_v57  ;;  %v1605_v59 = vpack.c.bf16 %v694_v19, %v692_v4  ;;  %v727_v57 = vmul.f32 %v717_v12, %v1864_v21 }
 0x365   : > { %v885_v26 = vsel %vm442_vm6, %v871_v58, %v879_v61  ;;  %v889_v18 = vsel %vm442_vm6, %v879_v61, %v871_v58 }
 0x366   : > { %v2275_v14 = vmul.f32 %v885_v26, %v1930_v6  ;;  %v2278_v60 = vmul.f32 %v889_v18, %v1933_v7  ;;  %1604 = vmatprep.subr.bf16.mxu1 %v1603_v8 }
 0x367   : > { %1606 = vmatpush1.bf16.msra.mxu1 %v1605_v59 }
 0x368   : > { %2617 = vst [vmem:[#allocation13_spill] sm:$0xff] %v2275_v14  ;;  %v2280_v4 = vpop.permute.xlu1 %902  ;;  %v681_v19 = vpop.permute.xlu0 %680  ;;  %v725_v14 = vmul.f32 %v2144_v1, %v1864_v21 }
 0x369   : > { %v686_v18 = vsel %vm327_vm2, %v673_v29, %v681_v19  ;;  %v690_v59 = vsel %vm327_vm2, %v681_v19, %v673_v29 }
 0x36a   : > { %v696_v61 = vmul.f32 %v690_v59, %v1871_v23  ;;  %v697_v13 = vmul.f32 %v686_v18, %v1875_v24  ;;  %v749_v18 = vsel %vm361_vm3, %v2178_v40, %v2188_v44 }
 0x36b   : > { %v759_v59 = vmul.f32 %v749_v18, %v1890_v35 }
 0x36c   : > { %v675_v58 = vpop.permute.xlu1 %674  ;;  %v705_v55 = vpop.permute.xlu0 %704 }
 0x370   : > { %v683_v8 = vpop.permute.xlu1 %682  ;;  %v713_v26 = vpop.permute.xlu0 %712 }
 0x371   : > { %v687_v62 = vsel %vm327_vm2, %v675_v58, %v683_v8  ;;  %v691_v52 = vsel %vm327_vm2, %v683_v8, %v675_v58  ;;  %v724_v58 = vmul.f32 %v2148_v3, %v1860_v20  ;;  %v722_v1 = vsel %vm344_vm1, %v713_v26, %v705_v55 }
 0x372   : > { %v698_v29 = vmul.f32 %v691_v52, %v1871_v23  ;;  %v699_v19 = vmul.f32 %v687_v62, %v1875_v24  ;;  %v1611_v23 = vpack.c.bf16 %v727_v57, %v725_v14  ;;  %v718_v24 = vsel %vm344_vm1, %v705_v55, %v713_v26 }
 0x373   : > { %v753_v3 = vsel %vm361_vm3, %v2188_v44, %v2178_v40  ;;  %v728_v55 = vmul.f32 %v722_v1, %v1860_v20  ;;  %v757_v40 = vmul.f32 %v2168_v33, %v1890_v35  ;;  %vm1244_vm2 = vcmask 130048  }
 0x374   : > { %v707_v36 = vpop.permute.xlu1 %706  ;;  %v737_v12 = vpop.permute.xlu0 %736  ;;  %v1607_v6 = vpack.c.bf16 %v699_v19, %v697_v13  ;;  %v1609_v63 = vpack.c.bf16 %v698_v29, %v696_v61  ;;  %v1613_v61 = vpack.c.bf16 %v726_v25, %v724_v58  ;;  %v758_v44 = vmul.f32 %v753_v3, %v1878_v27 }
 0x375   : > { %v756_v19 = vmul.f32 %v2172_v34, %v1878_v27  ;;  %v785_v34 = vsel %vm378_vm0, %v2196_v56, %v2190_v50 }
 0x376   : > { %1608 = vmatprep.subr.bf16.mxu1 %v1607_v6 }
 0x377   : > { %1610 = vmatpush1.bf16.msra.mxu1 %v1609_v63  ;;  %v729_v63 = vmul.f32 %v718_v24, %v1864_v21  ;;  %v1621_v18 = vpack.c.bf16 %v758_v44, %v756_v19 }
 0x378   : > { %v715_v52 = vpop.permute.xlu1 %714  ;;  %1612 = vmatprep.subr.bf16.mxu1 %v1611_v23  ;;  %v745_v13 = vpop.permute.xlu0 %744 }
 0x379   : > { %v719_v6 = vsel %vm344_vm1, %v707_v36, %v715_v52  ;;  %v723_v14 = vsel %vm344_vm1, %v715_v52, %v707_v36  ;;  %v750_v25 = vsel %vm361_vm3, %v737_v12, %v745_v13  ;;  %v754_v33 = vsel %vm361_vm3, %v745_v13, %v737_v12 }
 0x37a   : > { %v730_v8 = vmul.f32 %v723_v14, %v1860_v20  ;;  %v731_v26 = vmul.f32 %v719_v6, %v1864_v21  ;;  %v781_v20 = vsel %vm378_vm0, %v2190_v50, %v2196_v56  ;;  %v1619_v21 = vpack.c.bf16 %v759_v59, %v757_v40 }
 0x37b   : > { %1614 = vmatpush1.bf16.msra.mxu1 %v1613_v61  ;;  %v791_v23 = vmul.f32 %v781_v20, %v1851_v17  ;;  %v760_v12 = vmul.f32 %v754_v33, %v1878_v27  ;;  %v761_v52 = vmul.f32 %v750_v25, %v1890_v35  ;;  %v789_v50 = vmul.f32 %v2182_v9, %v1851_v17 }
 0x37c   : > { %v739_v0 = vpop.permute.xlu1 %738  ;;  %v769_v57 = vpop.permute.xlu0 %768  ;;  %v1615_v62 = vpack.c.bf16 %v731_v26, %v729_v63  ;;  %v1617_v29 = vpack.c.bf16 %v730_v8, %v728_v55  ;;  %v790_v14 = vmul.f32 %v785_v34, %v1848_v16  ;;  %v788_v63 = vmul.f32 %v2186_v10, %v1848_v16 }
 0x37d   : > { %v1627_v55 = vpack.c.bf16 %v791_v23, %v789_v50  ;;  %v799_v10 = vmul.f32 %v2020_v32, %v1900_v39  ;;  %v797_v32 = vmul.f32 %v2006_v2, %v1900_v39  ;;  %v800_v50 = vmul.f32 %v2059_v45, %v1897_v38 }
 0x37e   : > { %1616 = vmatprep.subr.bf16.mxu1 %v1615_v62  ;;  %v1629_v44 = vpack.c.bf16 %v790_v14, %v788_v63 }
 0x37f   : > { %1618 = vmatpush1.bf16.msra.mxu1 %v1617_v29 }
 0x380   : > { %v747_v36 = vpop.permute.xlu1 %746  ;;  %1620 = vmatprep.subr.bf16.mxu1 %v1619_v21  ;;  %v777_v58 = vpop.permute.xlu0 %776 }
 0x381   : > { %v751_v24 = vsel %vm361_vm3, %v739_v0, %v747_v36  ;;  %v755_v1 = vsel %vm361_vm3, %v747_v36, %v739_v0 }
 0x382   : > { %v762_v13 = vmul.f32 %v755_v1, %v1878_v27  ;;  %v763_v61 = vmul.f32 %v751_v24, %v1890_v35  ;;  %v782_v27 = vsel %vm378_vm0, %v769_v57, %v777_v58  ;;  %v786_v35 = vsel %vm378_vm0, %v777_v58, %v769_v57 }
 0x383   : > { %1622 = vmatpush1.bf16.msra.mxu1 %v1621_v18  ;;  %v792_v0 = vmul.f32 %v786_v35, %v1848_v16  ;;  %v793_v62 = vmul.f32 %v782_v27, %v1851_v17  ;;  %v1635_v58 = vpack.c.bf16 %v799_v10, %v797_v32  ;;  %v2620_v35 = vpack.c.bf16 %v2213_v46, %v2207_v37 }
 0x384   : > { %v771_v56 = vpop.permute.xlu1 %770  ;;  %v909_v3 = vpop.permute.xlu0 %908  ;;  %v1623_v59 = vpack.c.bf16 %v763_v61, %v761_v52  ;;  %v1625_v6 = vpack.c.bf16 %v762_v13, %v760_v12  ;;  %v2618_v61 = vpack.c.bf16 %v2009_v28, %v2012_v31 }
 0x385   : > { %v916_v19 = vsel %vm459_vm8, %v2226_v22, %v909_v3  ;;  %v920_v20 = vsel %vm459_vm8, %v909_v3, %v2226_v22  ;;  %v803_v22 = vmul.f32 %v2078_v51, %v1900_v39  ;;  %v802_v51 = vmul.f32 %v2072_v48, %v1897_v38 }
 0x386   : > { %1624 = vmatprep.subr.bf16.mxu1 %v1623_v59  ;;  %v924_v18 = vmul.f32 %v1962_v42, %v916_v19  ;;  %v925_v2 = vmul.f32 %v1967_v43, %v920_v20  ;;  %v2624_v20 = vld [vmem:[#allocation9_spill] sm:$0xff] }
 0x387   : > { %1626 = vmatpush1.bf16.msra.mxu1 %v1625_v6  ;;  %v2619_v6 = vpack.c.bf16 %v2216_v47, %v2210_v41  ;;  %v2625_v32 = vpack.c.bf16 %v2239_v11, %v2624_v20 }
 0x388   : > { %v779_v8 = vpop.permute.xlu1 %778  ;;  %1628 = vmatprep.subr.bf16.mxu1 %v1627_v55  ;;  %v809_v9 = vpop.permute.xlu0 %808 }
 0x389   : > { %v783_v26 = vsel %vm378_vm0, %v771_v56, %v779_v8  ;;  %v787_v40 = vsel %vm378_vm0, %v779_v8, %v771_v56 }
 0x38a   : > { %v794_v57 = vmul.f32 %v787_v40, %v1848_v16  ;;  %v795_v29 = vmul.f32 %v783_v26, %v1851_v17 }
 0x38b   : > { %1630 = vmatpush1.bf16.msra.mxu1 %v1629_v44  ;;  %v2621_v44 = vld [vmem:[#allocation10_spill] sm:$0xff] }
 0x38c   : > { %v911_v21 = vpop.permute.xlu1 %910  ;;  %v817_v25 = vpop.permute.xlu0 %816  ;;  %v1631_v33 = vpack.c.bf16 %v795_v29, %v793_v62  ;;  %v1633_v36 = vpack.c.bf16 %v794_v57, %v792_v0  ;;  %v2622_v10 = vpack.c.bf16 %v2242_v15, %v2621_v44  ;;  %v2623_v0 = vld [vmem:[#allocation6_spill] sm:$0xff] }
 0x38d   : > { %v917_v16 = vsel %vm459_vm8, %v2280_v4, %v911_v21  ;;  %v921_v17 = vsel %vm459_vm8, %v911_v21, %v2280_v4  ;;  %v801_v4 = vmul.f32 %v2065_v49, %v1900_v39  ;;  %v826_v59 = vsel %vm408_vm5, %v817_v25, %v809_v9 }
 0x38e   : > { %v926_v34 = vmul.f32 %v1962_v42, %v917_v16  ;;  %v927_v23 = vmul.f32 %v1967_v43, %v921_v17  ;;  %1632 = vmatprep.subr.bf16.mxu1 %v1631_v33  ;;  %v1641_v49 = vpack.c.bf16 %v802_v51, %v800_v50  ;;  %v822_v31 = vsel %vm408_vm5, %v809_v9, %v817_v25 }
 0x38f   : > { %1634 = vmatpush1.bf16.msra.mxu1 %v1633_v36  ;;  %v1639_v13 = vpack.c.bf16 %v803_v22, %v801_v4  ;;  %v833_v38 = vmul.f32 %v826_v59, %v1916_v54  ;;  %v832_v27 = vmul.f32 %v822_v31, %v1913_v53  ;;  %v2626_v22 = vld [vmem:[#allocation12_spill] sm:$0xff]  ;;  %v2630_v4 = vld [vmem:[#allocation11_spill] sm:$0xff] }
 0x390   : > { %v1669_v24 = vpack.c.bf16 %v926_v34, %v924_v18  ;;  %v811_v1 = vpop.permute.xlu1 %810  ;;  %1636 = vmatprep.subr.bf16.mxu1 %v1635_v58  ;;  %v841_v12 = vpop.permute.xlu0 %840  ;;  %v1667_v52 = vpack.c.bf16 %v927_v23, %v925_v2  ;;  %v2627_v18 = vpack.c.bf16 %v2278_v60, %v2626_v22  ;;  %v2628_v2 = vld [vmem:[#allocation5_spill] sm:$0xff] }
 0x392   : > { %1668 = vmatprep.subr.bf16.mxu0 %v1667_v52  ;;  %v2629_v52 = vld [vmem:[#allocation13_spill] sm:$0xff] }
 0x393   : > { %1638 = vmatpush1.bf16.msra.mxu1 %v2618_v61  ;;  %1670 = vmatpush1.bf16.msra.mxu0 %v1669_v24 }
 0x394   : > { %v819_v56 = vpop.permute.xlu1 %818  ;;  %1640 = vmatprep.subr.bf16.mxu1 %v1639_v13  ;;  %v849_v3 = vpop.permute.xlu0 %848 }
 0x395   : > { %v827_v39 = vsel %vm408_vm5, %v819_v56, %v811_v1  ;;  %v823_v48 = vsel %vm408_vm5, %v811_v1, %v819_v56 }
 0x396   : > { %v835_v28 = vmul.f32 %v827_v39, %v1916_v54  ;;  %v834_v55 = vmul.f32 %v823_v48, %v1913_v53  ;;  %v858_v54 = vsel %vm425_vm7, %v849_v3, %v841_v12  ;;  %v854_v53 = vsel %vm425_vm7, %v841_v12, %v849_v3  ;;  %v2632_v48 = vld [vmem:[#allocation7_spill] sm:$0xff] }
 0x397   : > { %1642 = vmatpush1.bf16.msra.mxu1 %v1641_v49  ;;  %v865_v37 = vmul.f32 %v858_v54, %v1950_v30  ;;  %v864_v19 = vmul.f32 %v854_v53, %v2623_v0 }
 0x398   : > { %v843_v45 = vpop.permute.xlu1 %842  ;;  %1644 = vmatprep.subr.bf16.mxu1 %v2619_v6  ;;  %v873_v14 = vpop.permute.xlu0 %872  ;;  %v1647_v63 = vpack.c.bf16 %v835_v28, %v833_v38  ;;  %v1649_v47 = vpack.c.bf16 %v834_v55, %v832_v27  ;;  %v2634_v28 = vmov 0.0  }
 0x39b   : > { %1646 = vmatpush1.bf16.msra.mxu1 %v2620_v35 }
 0x39c   : > { %v851_v8 = vpop.permute.xlu1 %850  ;;  %1648 = vmatprep.subr.bf16.mxu1 %v1647_v63  ;;  %v881_v9 = vpop.permute.xlu0 %880 }
 0x39d   : > { %v859_v41 = vsel %vm425_vm7, %v851_v8, %v843_v45  ;;  %v855_v26 = vsel %vm425_vm7, %v843_v45, %v851_v8  ;;  %v886_v16 = vsel %vm442_vm6, %v873_v14, %v881_v9 }
 0x39e   : > { %v867_v40 = vmul.f32 %v859_v41, %v1950_v30  ;;  %v866_v62 = vmul.f32 %v855_v26, %v2623_v0  ;;  %v890_v30 = vsel %vm442_vm6, %v881_v9, %v873_v14  ;;  %v896_v24 = vmul.f32 %v886_v16, %v2628_v2 }
 0x39f   : > { %1650 = vmatpush1.bf16.msra.mxu1 %v1649_v47  ;;  %v897_v11 = vmul.f32 %v890_v30, %v1933_v7 }
 0x3a0   : > { %v875_v46 = vpop.permute.xlu1 %874  ;;  %1652 = vmatprep.subr.bf16.mxu1 %v2622_v10  ;;  %v905_v57 = vpop.permute.xlu0 %904  ;;  %v1655_v29 = vpack.c.bf16 %v867_v40, %v865_v37  ;;  %v1657_v15 = vpack.c.bf16 %v866_v62, %v864_v19  ;;  %v2636_v62 = vld [vmem:[#allocation4_spill] sm:$0xff] }
 0x3a3   : > { %1654 = vmatpush1.bf16.msra.mxu1 %v2625_v32 }
 0x3a4   : > { %v883_v21 = vpop.permute.xlu1 %882  ;;  %1656 = vmatprep.subr.bf16.mxu1 %v1655_v29  ;;  %v913_v17 = vpop.permute.xlu0 %912  ;;  %v2637_v29 = vld [vmem:[#allocation3_spill] sm:$0xff] }
 0x3a5   : > { %v891_v25 = vsel %vm442_vm6, %v883_v21, %v875_v46  ;;  %v887_v33 = vsel %vm442_vm6, %v875_v46, %v883_v21  ;;  %v918_v1 = vsel %vm459_vm8, %v905_v57, %v913_v17  ;;  %v922_v12 = vsel %vm459_vm8, %v913_v17, %v905_v57  ;;  %v2635_v46 = vld [vmem:[#allocation2_spill] sm:$0xff] }
 0x3a6   : > { %v899_v36 = vmul.f32 %v891_v25, %v1933_v7  ;;  %v898_v34 = vmul.f32 %v887_v33, %v2628_v2  ;;  %v2631_v7 = vpack.c.bf16 %v2629_v52, %v2630_v4  ;;  %v928_v50 = vmul.f32 %v1962_v42, %v918_v1 }
 0x3a7   : > { %1658 = vmatpush1.bf16.msra.mxu1 %v1657_v15  ;;  %v929_v56 = vmul.f32 %v1967_v43, %v922_v12  ;;  %v2481_v44 = vadd.s32 8, %v2635_v46 }
 0x3a8   : > { %v907_v58 = vpop.permute.xlu1 %906  ;;  %1660 = vmatprep.subr.bf16.mxu1 %v2627_v18  ;;  %v1663_v23 = vpack.c.bf16 %v899_v36, %v897_v11  ;;  %v1665_v61 = vpack.c.bf16 %v898_v34, %v896_v24 }
 0x3ab   : > { %1662 = vmatpush1.bf16.msra.mxu1 %v2631_v7 }
 0x3ac   : > { %v915_v51 = vpop.permute.xlu1 %914  ;;  %1664 = vmatprep.subr.bf16.mxu1 %v1663_v23 }
 0x3ad   : > { %v919_v60 = vsel %vm459_vm8, %v907_v58, %v915_v51  ;;  %v923_v13 = vsel %vm459_vm8, %v915_v51, %v907_v58 }
 0x3ae   : > { %v930_v3 = vmul.f32 %v1962_v42, %v919_v60  ;;  %v931_v59 = vmul.f32 %v1967_v43, %v923_v13 }
 0x3af   : > { %1666 = vmatpush1.bf16.msra.mxu1 %v1665_v61 }
 0x3b0   : > { %v1673_v39 = vpack.c.bf16 %v930_v3, %v928_v50  ;;  %v1671_v49 = vpack.c.bf16 %v931_v59, %v929_v56 }
 0x3b2   : > { %1672 = vmatprep.subr.bf16.mxu0 %v1671_v49  ;;  %1026 = vmatmul.mubr.f32.vlgmr.msra.gmra.mrb[0].mxu1 %v2632_v48 }
 0x3b3   : > { %1674 = vmatpush1.bf16.msra.mxu0 %v1673_v39 }
 0x3b5   : > { %v937_v31 = vpop.permute.xlu0 %936 }
 0x3b6   : > { %1587 = vmatmul.mubr.msk.f32.vlgmr.msra.gmra.mrb[8].mxu0 %vm958_vm11, %v2633_v5 }
 0x3b7   : > { %1333 = vmatprep.mubr.f32.mxu0 %v2634_v28 }
 0x485   : > { %v1027_v38 = vpop.f32.mrb[0].mxu1 }
 0x486   : > { %v1028_v45 = vadd.f32 %v1027_v38, %v937_v31  ;;  %v1029_v6 = vpop.f32.mrb[1].mxu1 }
 0x487   : > { %v1030_v42 = vadd.f32 %v1029_v6, %v937_v31 }
 0x489   : > { %v1098_v14 = vpop.f32.mrb[8].mxu0 }
 0x48a   : > { %v1099_v43 = vadd.f32 %v1098_v14, %v1028_v45  ;;  %v1100_v55 = vpop.f32.mrb[9].mxu0  ;;  %v1236_v45 = vld [vmem:[%s2513_s18] sm:$0xff] }
 0x48b   : > { %v1101_v63 = vadd.f32 %v1100_v55, %v1030_v42 }
 0x48c   : > { %v1115_v27 = vadd.f32 1.0, %v1099_v43 }
 0x48d   : > { %v1105_v35 = vcombine.low %v1099_v43, %v1101_v63  ;;  %v1116_v8 = vadd.f32 1.0, %v1101_v63 }
 0x48e   : > { %v1117_v9 = vmul.f32 7.5, %v1115_v27 }
 0x48f   : > { %1588 = vst.sshfl [vmem:[%s311_s14] sm:$0x33 pattern:$0x76325410] %v1105_v35  ;;  %v1118_v54 = vmul.f32 7.5, %v1116_v8  ;;  %v1237_v35 = vld [vmem:[%s2513_s18 + $0x8] sm:$0xff]  ;;  %v1238_v8 = vld [vmem:[%s2513_s18 + $0x10] sm:$0xff] }
 0x490   : > { %v1119_v41 = vfloor.f32 %v1117_v9 }
 0x491   : > { %v1120_v47 = vfloor.f32 %v1118_v54 }
 0x492   : > { %v1121_v26 = vsub.f32 %v1117_v9, %v1119_v41  ;;  %v1683_v40 = vtrunc.f32 %v1119_v41  ;;  %v1239_v9 = vld [vmem:[%s2513_s18 + $0x18] sm:$0xff]  ;;  %v1241_v41 = vld [vmem:[%s2513_s18 + $0x28] sm:$0xff] }
 0x493   : > { %v1122_v53 = vsub.f32 %v1118_v54, %v1120_v47  ;;  %v1685_v37 = vtrunc.f32 %v1120_v47  ;;  %v1240_v54 = vld [vmem:[%s2513_s18 + $0x20] sm:$0xff]  ;;  %v1242_v47 = vld [vmem:[%s2513_s18 + $0x30] sm:$0xff] }
 0x494   : > { %v1123_v10 = vsub.f32 1.0, %v1121_v26  ;;  %v1684_v0 = vcvt.f32.s32 %v1683_v40  ;;  %v1171_v57 = vrot.slane %v1121_v26, %v2636_v62  ;;  %v1223_v19 = vrot.slane %v1121_v26, %v2637_v29  ;;  %v1243_v26 = vld [vmem:[%s2513_s18 + $0x38] sm:$0xff] }
 0x495   : > { %v1124_v20 = vsub.f32 1.0, %v1122_v53  ;;  %v1686_v32 = vcvt.f32.s32 %v1685_v37  ;;  %v1227_v21 = vrot.slane %v1122_v53, %v2637_v29  ;;  %v1175_v30 = vrot.slane %v1122_v53, %v2636_v62 }
 0x496   : > { %v1127_v25 = vadd.s32 1, %v1684_v0  ;;  %v1135_v15 = vrot.slane %v1684_v0, %v2636_v62  ;;  %v1147_v33 = vrot.slane %v1123_v10, %v2636_v62  ;;  %v1187_v36 = vrot.slane %v1684_v0, %v2637_v29 }
 0x497   : > { %v1191_v16 = vrot.slane %v1686_v32, %v2637_v29  ;;  %v1128_v11 = vadd.s32 1, %v1686_v32  ;;  %v1139_v17 = vrot.slane %v1686_v32, %v2636_v62  ;;  %v1151_v58 = vrot.slane %v1124_v20, %v2636_v62 }
 0x498   : > { %vm1140_vm12 = vcmp.eq.s32.totalorder %v2635_v46, %v1135_v15  ;;  %vm1142_vm13 = vcmp.eq.s32.totalorder %v2481_v44, %v1135_v15  ;;  %v1159_v22 = vrot.slane %v1127_v25, %v2636_v62  ;;  %vm1192_vm14 = vcmp.eq.s32.totalorder %v2635_v46, %v1187_v36 }
 0x499   : > { %vm1141_vm15 = vcmp.eq.s32.totalorder %v2635_v46, %v1139_v17  ;;  %vm1143_vm0 = vcmp.eq.s32.totalorder %v2481_v44, %v1139_v17  ;;  %v1163_v18 = vrot.slane %v1128_v11, %v2636_v62  ;;  %v1152_v2 = vsel %vm1140_vm12, %v1147_v33, 0.0 }
 0x49a   : > { %v1153_v34 = vsel %vm1141_vm15, %v1151_v58, 0.0  ;;  %v1155_v23 = vsel %vm1143_vm0, %v1151_v58, 0.0  ;;  %v1154_v24 = vsel %vm1142_vm13, %v1147_v33, 0.0  ;;  %vm1164_vm1 = vcmp.eq.s32.totalorder %v2635_v46, %v1159_v22 }
 0x49b   : > { %vm1165_vm3 = vcmp.eq.s32.totalorder %v2635_v46, %v1163_v18  ;;  %vm1167_vm4 = vcmp.eq.s32.totalorder %v2481_v44, %v1163_v18  ;;  %vm1166_vm5 = vcmp.eq.s32.totalorder %v2481_v44, %v1159_v22  ;;  %v1176_v1 = vsel %vm1164_vm1, %v1171_v57, 0.0 }
 0x49c   : > { %v1177_v12 = vsel %vm1165_vm3, %v1175_v30, 0.0  ;;  %v1179_v52 = vsel %vm1167_vm4, %v1175_v30, 0.0  ;;  %v1178_v4 = vsel %vm1166_vm5, %v1171_v57, 0.0  ;;  %v1180_v7 = vadd.f32 %v1176_v1, %v1152_v2 }
 0x49d   : > { %v1181_v51 = vadd.f32 %v1177_v12, %v1153_v34  ;;  %v1183_v60 = vadd.f32 %v1179_v52, %v1155_v23  ;;  %v1182_v13 = vadd.f32 %v1178_v4, %v1154_v24  ;;  %v1199_v61 = vrot.slane %v1123_v10, %v2637_v29 }
 0x49e   : > { %v1211_v50 = vrot.slane %v1127_v25, %v2637_v29  ;;  %vm1193_vm6 = vcmp.eq.s32.totalorder %v2635_v46, %v1191_v16  ;;  %v1203_v56 = vrot.slane %v1124_v20, %v2637_v29  ;;  %v1215_v3 = vrot.slane %v1128_v11, %v2637_v29 }
 0x49f   : > { %v1675_v59 = vpack.c.bf16 %v1183_v60, %v1181_v51  ;;  %v1677_v39 = vpack.c.bf16 %v1182_v13, %v1180_v7  ;;  %v1204_v49 = vsel %vm1192_vm14, %v1199_v61, 0.0  ;;  %vm1194_vm7 = vcmp.eq.s32.totalorder %v2481_v44, %v1187_v36 }
 0x4a0   : > { %vm1216_vm8 = vcmp.eq.s32.totalorder %v2635_v46, %v1211_v50  ;;  %v1205_v48 = vsel %vm1193_vm6, %v1203_v56, 0.0  ;;  %vm1217_vm10 = vcmp.eq.s32.totalorder %v2635_v46, %v1215_v3  ;;  %v1206_v5 = vsel %vm1194_vm7, %v1199_v61, 0.0 }
 0x4a1   : > { %1676 = vmatprep.subr.bf16.mxu0 %v1675_v59  ;;  %v1228_v31 = vsel %vm1216_vm8, %v1223_v19, 0.0  ;;  %v1229_v38 = vsel %vm1217_vm10, %v1227_v21, 0.0  ;;  %vm1218_vm11 = vcmp.eq.s32.totalorder %v2481_v44, %v1211_v50  ;;  %vm1195_vm12 = vcmp.eq.s32.totalorder %v2481_v44, %v1191_v16 }
 0x4a2   : > { %1678 = vmatpush1.bf16.msra.mxu0 %v1677_v39  ;;  %v2523_v6 = vadd.f32 %v1228_v31, %v1204_v49  ;;  %v2525_v42 = vadd.f32 %v1229_v38, %v1205_v48  ;;  %v1230_v14 = vsel %vm1218_vm11, %v1223_v19, 0.0  ;;  %v1207_v43 = vsel %vm1195_vm12, %v1203_v56, 0.0 }
 0x4a3   : > { %v2527_v55 = vadd.f32 %v1230_v14, %v1206_v5  ;;  %vm1219_vm13 = vcmp.eq.s32.totalorder %v2481_v44, %v1215_v3  ;;  %vm1454_vm14 = vcmask 1040384   ;;  %vm1459_vm15 = vcmask 1042432  }
 0x4a4   : > { %v1231_v63 = vsel %vm1219_vm13, %v1227_v21, 0.0 }
 0x4a5   : > { %1589 = vmatmul.mubr.msk.f32.vlgmr.msra.gmra.mrb[10].mxu0 %vm1244_vm2, %v1236_v45  ;;  %v2531_v27 = vadd.f32 %v1231_v63, %v1207_v43 }
 0x4a6   : > { %1339 = vmatprep.mubr.f32.mxu0 %v2634_v28 }
 0x4a9   : > { %1590 = vmatmul.mubr.msk.f32.gmra.mrb[12].mxu0 %vm1244_vm2, %v1237_v35 }
 0x4aa   : > { %1345 = vmatprep.mubr.f32.mxu0 %v2634_v28 }
 0x4ad   : > { %1591 = vmatmul.mubr.msk.f32.gmra.mrb[14].mxu0 %vm1244_vm2, %v1238_v8 }
 0x4ae   : > { %1351 = vmatprep.mubr.f32.mxu0 %v2634_v28 }
 0x4b1   : > { %1592 = vmatmul.mubr.msk.f32.gmra.mrb[16].mxu0 %vm1244_vm2, %v1239_v9 }
 0x4b2   : > { %1357 = vmatprep.mubr.f32.mxu0 %v2634_v28 }
 0x4b5   : > { %1593 = vmatmul.mubr.msk.f32.gmra.mrb[18].mxu0 %vm1244_vm2, %v1240_v54 }
 0x4b6   : > { %1363 = vmatprep.mubr.f32.mxu0 %v2634_v28 }
 0x4b9   : > { %1594 = vmatmul.mubr.msk.f32.gmra.mrb[20].mxu0 %vm1244_vm2, %v1241_v41 }
 0x4ba   : > { %1369 = vmatprep.mubr.f32.mxu0 %v2634_v28 }
 0x4bd   : > { %1595 = vmatmul.mubr.msk.f32.gmra.mrb[22].mxu0 %vm1244_vm2, %v1242_v47 }
 0x4be   : > { %1375 = vmatprep.mubr.f32.mxu0 %v2634_v28 }
 0x4c1   : > { %1596 = vmatmul.mubr.msk.f32.gmra.mrb[24].mxu0 %vm1244_vm2, %v1243_v26 }
 0x578   : > { %v1335_v40 = vpop.f32.mrb[10].mxu0 }
 0x579   : > { %v1382_v53 = vmul.f32 %v1335_v40, %v2523_v6  ;;  %v1337_v37 = vpop.f32.mrb[11].mxu0 }
 0x57a   : > { %v1383_v46 = vmul.f32 %v1337_v37, %v2525_v42 }
 0x57c   : > { %v1341_v44 = vpop.f32.mrb[12].mxu0 }
 0x57d   : > { %v1384_v10 = vmul.f32 %v1341_v44, %v2527_v55  ;;  %v1343_v0 = vpop.f32.mrb[13].mxu0 }
 0x57e   : > { %v1385_v62 = vmul.f32 %v1343_v0, %v2531_v27 }
 0x57f   : > { %v1386_v57 = vadd.f32 %v1384_v10, %v1382_v53 }
 0x580   : > { %v1393_v29 = vadd.f32 %v1385_v62, %v1383_v46  ;;  %v1347_v19 = vpop.f32.mrb[14].mxu0 }
 0x581   : > { %v1387_v20 = vrot.slane %v1386_v57, 4  ;;  %v1400_v28 = vmul.f32 %v1347_v19, %v2523_v6  ;;  %v1349_v32 = vpop.f32.mrb[15].mxu0 }
 0x582   : > { %v1394_v21 = vrot.slane %v1393_v29, 4  ;;  %v1401_v30 = vmul.f32 %v1349_v32, %v2525_v42 }
 0x583   : > { %v1388_v25 = vadd.f32 %v1387_v20, %v1386_v57 }
 0x584   : > { %v1395_v15 = vadd.f32 %v1394_v21, %v1393_v29  ;;  %v1353_v33 = vpop.f32.mrb[16].mxu0 }
 0x585   : > { %v1402_v36 = vmul.f32 %v1353_v33, %v2527_v55  ;;  %v1355_v16 = vpop.f32.mrb[17].mxu0  ;;  %v1389_v17 = vrot.slane %v1388_v25, 2 }
 0x586   : > { %v1403_v11 = vmul.f32 %v1355_v16, %v2531_v27  ;;  %v1396_v22 = vrot.slane %v1395_v15, 2 }
 0x587   : > { %v1404_v58 = vadd.f32 %v1402_v36, %v1400_v28  ;;  %v1390_v52 = vadd.f32 %v1389_v17, %v1388_v25 }
 0x588   : > { %v1411_v18 = vadd.f32 %v1403_v11, %v1401_v30  ;;  %v1359_v2 = vpop.f32.mrb[18].mxu0  ;;  %v1397_v7 = vadd.f32 %v1396_v22, %v1395_v15 }
 0x589   : > { %v1405_v34 = vrot.slane %v1404_v58, 4  ;;  %v1418_v23 = vmul.f32 %v1359_v2, %v2523_v6  ;;  %v1361_v24 = vpop.f32.mrb[19].mxu0  ;;  %v1391_v59 = vrot.slane %v1390_v52, 1 }
 0x58a   : > { %v1412_v1 = vrot.slane %v1411_v18, 4  ;;  %v1419_v12 = vmul.f32 %v1361_v24, %v2525_v42  ;;  %v1398_v48 = vrot.slane %v1397_v7, 1 }
 0x58b   : > { %v1406_v4 = vadd.f32 %v1405_v34, %v1404_v58  ;;  %v1392_v54 = vadd.f32 %v1391_v59, %v1390_v52 }
 0x58c   : > { %v1413_v51 = vadd.f32 %v1412_v1, %v1411_v18  ;;  %v1365_v60 = vpop.f32.mrb[20].mxu0  ;;  %v1399_v26 = vadd.f32 %v1398_v48, %v1397_v7 }
 0x58d   : > { %v1407_v13 = vrot.slane %v1406_v4, 2  ;;  %v1420_v61 = vmul.f32 %v1365_v60, %v2527_v55  ;;  %v1367_v50 = vpop.f32.mrb[21].mxu0 }
 0x58e   : > { %v1414_v56 = vrot.slane %v1413_v51, 2  ;;  %v1421_v3 = vmul.f32 %v1367_v50, %v2531_v27 }
 0x58f   : > { %v1408_v39 = vadd.f32 %v1407_v13, %v1406_v4  ;;  %v1422_v49 = vadd.f32 %v1420_v61, %v1418_v23 }
 0x590   : > { %v1415_v5 = vadd.f32 %v1414_v56, %v1413_v51  ;;  %v1429_v31 = vadd.f32 %v1421_v3, %v1419_v12  ;;  %v1371_v38 = vpop.f32.mrb[22].mxu0 }
 0x591   : > { %v1409_v45 = vrot.slane %v1408_v39, 1  ;;  %v1423_v14 = vrot.slane %v1422_v49, 4  ;;  %v1436_v43 = vmul.f32 %v1371_v38, %v2523_v6  ;;  %v1373_v63 = vpop.f32.mrb[23].mxu0 }
 0x592   : > { %v1416_v35 = vrot.slane %v1415_v5, 1  ;;  %v1430_v8 = vrot.slane %v1429_v31, 4  ;;  %v1437_v9 = vmul.f32 %v1373_v63, %v2525_v42 }
 0x593   : > { %v1410_v41 = vadd.f32 %v1409_v45, %v1408_v39  ;;  %v1424_v47 = vadd.f32 %v1423_v14, %v1422_v49 }
 0x594   : > { %v1417_v40 = vadd.f32 %v1416_v35, %v1415_v5  ;;  %v1431_v53 = vadd.f32 %v1430_v8, %v1429_v31  ;;  %v1377_v37 = vpop.f32.mrb[24].mxu0 }
 0x595   : > { %v1455_v46 = vsel %vm1454_vm14, %v1392_v54, %v1410_v41  ;;  %v1425_v44 = vrot.slane %v1424_v47, 2  ;;  %v1438_v10 = vmul.f32 %v1377_v37, %v2527_v55  ;;  %v1379_v0 = vpop.f32.mrb[25].mxu0 }
 0x596   : > { %v1456_v62 = vsel %vm1454_vm14, %v1399_v26, %v1417_v40  ;;  %v1432_v6 = vrot.slane %v1431_v53, 2  ;;  %v1439_v57 = vmul.f32 %v1379_v0, %v2531_v27 }
 0x597   : > { %v1426_v29 = vadd.f32 %v1425_v44, %v1424_v47  ;;  %v1440_v19 = vadd.f32 %v1438_v10, %v1436_v43 }
 0x598   : > { %v1433_v20 = vadd.f32 %v1432_v6, %v1431_v53  ;;  %v1447_v42 = vadd.f32 %v1439_v57, %v1437_v9 }
 0x599   : > { %v1427_v28 = vrot.slane %v1426_v29, 1  ;;  %v1441_v32 = vrot.slane %v1440_v19, 4 }
 0x59a   : > { %v1434_v21 = vrot.slane %v1433_v20, 1  ;;  %v1448_v30 = vrot.slane %v1447_v42, 4 }
 0x59b   : > { %v1428_v25 = vadd.f32 %v1427_v28, %v1426_v29  ;;  %v1442_v15 = vadd.f32 %v1441_v32, %v1440_v19 }
 0x59c   : > { %v1435_v33 = vadd.f32 %v1434_v21, %v1433_v20  ;;  %v1449_v36 = vadd.f32 %v1448_v30, %v1447_v42 }
 0x59d   : > { %v1457_v55 = vsel %vm535_vm9, %v1455_v46, %v1428_v25  ;;  %v1443_v16 = vrot.slane %v1442_v15, 2 }
 0x59e   : > { %v1458_v11 = vsel %vm535_vm9, %v1456_v62, %v1435_v33  ;;  %v1450_v17 = vrot.slane %v1449_v36, 2 }
 0x59f   : > { %v1444_v27 = vadd.f32 %v1443_v16, %v1442_v15 }
 0x5a0   : > { %v1451_v58 = vadd.f32 %v1450_v17, %v1449_v36 }
 0x5a1   : > { %v1445_v22 = vrot.slane %v1444_v27, 1 }
 0x5a2   : > { %v1452_v18 = vrot.slane %v1451_v58, 1 }
 0x5a3   : > { %v1446_v2 = vadd.f32 %v1445_v22, %v1444_v27 }
 0x5a4   : > { %v1453_v34 = vadd.f32 %v1452_v18, %v1451_v58 }
 0x5a5   : > { %v1460_v23 = vsel %vm1459_vm15, %v1457_v55, %v1446_v2 }
 0x5a6   : > { %v1461_v24 = vsel %vm1459_vm15, %v1458_v11, %v1453_v34 }
 0x5a7   : > { %v1464_v1 = vcombine.low %v1460_v23, %v1461_v24 }
 0x5a9   : > { %1466 = vst [vmem:[%s306_s21] sm:$0xff] %v1464_v1 }
 0x5aa PF: > { %s18_s24 = sadd.s32 1, %s1725_s24  }
 0x5ab   : > { %p15_p4 = scmp.ge.s32.totalorder %s18_s24, 4  }
 0x5ad   :  { %17 = sbr.rel (!%p15_p4) target bundleno = 1 (0x1), region = 89 }

</bundles_post_ra>
